<compile_context>
chip_gen: v7x
topology: tpu7x:2x2x1
jax: 0.10.0
libtpu: 0.0.40
codegen_flags: <defaults>
</compile_context>

<pallas_src>
import functools
import math

import jax
import jax.numpy as jnp
from jax.experimental import pallas as pl
from jax.experimental.pallas import tpu as pltpu


# ---------------------------------------------------------------------------
# helpers
# ---------------------------------------------------------------------------

def _ln(x, g, b, eps=1e-12):
    """LayerNorm over the last (hidden) dim; x/g/b are f32."""
    mean = jnp.mean(x, axis=-1, keepdims=True)
    var = jnp.mean(jnp.square(x - mean), axis=-1, keepdims=True)
    return (x - mean) * jax.lax.rsqrt(var + eps) * g + b


# ---------------------------------------------------------------------------
# Fused BERT encoder kernel: grid = (batch, layer)
# ---------------------------------------------------------------------------

def _bert_encoder_kernel(emb_ref, maskb_ref, embg_ref, embb_ref,
                         wqkv_ref, bqkv_ref, wo_ref, bo_ref,
                         ln1g_ref, ln1b_ref,
                         w1_ref, b1_ref, w2_ref, b2_ref,
                         ln2g_ref, ln2b_ref,
                         poolw_ref, poolb_ref,
                         hid_ref, pool_ref,
                         x_scr, *, n_heads):
    """One transformer layer for one batch element; hidden state carried in
    VMEM scratch across the (inner, 'arbitrary') layer grid axis."""
    l = pl.program_id(1)
    n_layers = pl.num_programs(1)

    # --- l == 0: embedding LayerNorm seeds the resident hidden state -------
    @pl.when(l == 0)
    def _():
        e = emb_ref[0].astype(jnp.float32)                   # (S, H)
        x_scr[...] = _ln(e, embg_ref[...], embb_ref[...])

    x = x_scr[...]                                           # (S, H) f32
    H = x.shape[-1]
    Dh = H // n_heads
    x_bf = x.astype(jnp.bfloat16)

    # --- fused QKV projection (1/sqrt(Dh) pre-folded into Wq/bq) -----------
    qkv = jnp.dot(x_bf, wqkv_ref[0],
                  preferred_element_type=jnp.float32) + bqkv_ref[0]
    q = qkv[:, :H]
    k = qkv[:, H:2 * H]
    v = qkv[:, 2 * H:]

    mask_bias = maskb_ref[0]                                 # (1, S) additive f32

    # --- per-head attention; heads are static lane slices, context is ------
    # --- re-assembled into a lane-dense (S, H) slab -------------------------
    ctx_heads = []
    for h in range(n_heads):
        sl = slice(h * Dh, (h + 1) * Dh)
        qh = q[:, sl].astype(jnp.bfloat16)
        kh = k[:, sl].astype(jnp.bfloat16)
        vh = v[:, sl].astype(jnp.bfloat16)
        # q @ k^T without materializing a transpose: contract the last dims.
        s = jax.lax.dot_general(qh, kh, (((1,), (1,)), ((), ())),
                                preferred_element_type=jnp.float32)
        s = s + mask_bias                                    # f32 mask add
        s = s - jnp.max(s, axis=-1, keepdims=True)
        p = jnp.exp(s)
        p = p * pl.reciprocal(jnp.sum(p, axis=-1, keepdims=True), approx=True)
        ctx_heads.append(jnp.dot(p.astype(jnp.bfloat16), vh,
                                 preferred_element_type=jnp.float32))
    ctx = jnp.concatenate(ctx_heads, axis=-1)                # (S, H) f32

    # --- attention output projection + residual + LN1 ----------------------
    attn = jnp.dot(ctx.astype(jnp.bfloat16), wo_ref[0],
                   preferred_element_type=jnp.float32) + bo_ref[0]
    x1 = _ln(attn + x, ln1g_ref[0], ln1b_ref[0])

    # --- FFN: GELU(x1 W1 + b1) W2 + b2, residual + LN2 ----------------------
    # TODO(synk): HF BERT default is erf-GELU; tanh approximation used for
    # robust Mosaic lowering (difference < 1e-3 at these magnitudes).
    hdn = jnp.dot(x1.astype(jnp.bfloat16), w1_ref[0],
                  preferred_element_type=jnp.float32) + b1_ref[0]
    hdn = jax.nn.gelu(hdn, approximate=True)
    ffn = jnp.dot(hdn.astype(jnp.bfloat16), w2_ref[0],
                  preferred_element_type=jnp.float32) + b2_ref[0]
    out = _ln(ffn + x1, ln2g_ref[0], ln2b_ref[0])            # (S, H) f32

    x_scr[...] = out                                         # carry to layer l+1

    # --- pooler fused into the final layer step -----------------------------
    # (tiny (1,H)x(H,H) matmul; computed unconditionally, stored only at the
    #  last layer — keeps all MXU ops at the top level of the kernel)
    cls = out[0:1, :]                                        # (1, H)
    pooled = jnp.tanh(jnp.dot(cls.astype(jnp.bfloat16), poolw_ref[...],
                              preferred_element_type=jnp.float32)
                      + poolb_ref[...])                      # (1, H)

    @pl.when(l == n_layers - 1)
    def _():
        hid_ref[...] = out.reshape(hid_ref.shape).astype(hid_ref.dtype)
        pool_ref[...] = pooled.reshape(pool_ref.shape).astype(pool_ref.dtype)


def bert_encoder(emb, mask_bias, packed, *, n_heads):
    """Single fused pallas_call over grid=(B, L)."""
    B, S, H = emb.shape
    L = packed["wqkv"].shape[0]
    I = packed["w1"].shape[2]

    batch_map = lambda b, l: (b, 0, 0)       # per-batch blocks, resident over l
    layer_map = lambda b, l: (l, 0, 0)       # per-layer weight blocks
    const_map = lambda b, l: (0, 0)          # shared (emb-LN / pooler) params

    kernel = functools.partial(_bert_encoder_kernel, n_heads=n_heads)
    last_hidden, pooled = pl.pallas_call(
        kernel,
        out_shape=(jax.ShapeDtypeStruct((B, S, H), jnp.float32),
                   jax.ShapeDtypeStruct((B, 1, H), jnp.float32)),
        grid=(B, L),
        in_specs=[
            pl.BlockSpec((1, S, H), batch_map),        # emb (pre-LN)
            pl.BlockSpec((1, 1, S), batch_map),        # additive mask bias
            pl.BlockSpec((1, H), const_map),           # emb_ln_g
            pl.BlockSpec((1, H), const_map),           # emb_ln_b
            pl.BlockSpec((1, H, 3 * H), layer_map),    # wqkv (bf16)
            pl.BlockSpec((1, 1, 3 * H), layer_map),    # bqkv
            pl.BlockSpec((1, H, H), layer_map),        # wo (bf16)
            pl.BlockSpec((1, 1, H), layer_map),        # bo
            pl.BlockSpec((1, 1, H), layer_map),        # ln1_g
            pl.BlockSpec((1, 1, H), layer_map),        # ln1_b
            pl.BlockSpec((1, H, I), layer_map),        # w1 (bf16)
            pl.BlockSpec((1, 1, I), layer_map),        # b1
            pl.BlockSpec((1, I, H), layer_map),        # w2 (bf16)
            pl.BlockSpec((1, 1, H), layer_map),        # b2
            pl.BlockSpec((1, 1, H), layer_map),        # ln2_g
            pl.BlockSpec((1, 1, H), layer_map),        # ln2_b
            pl.BlockSpec((H, H), const_map),           # pool_w (bf16)
            pl.BlockSpec((1, H), const_map),           # pool_b
        ],
        out_specs=(pl.BlockSpec((1, S, H), batch_map),     # last_hidden_state
                   pl.BlockSpec((1, 1, H), batch_map)),    # pooled_output
        scratch_shapes=[pltpu.VMEM((S, H), jnp.float32)],  # resident hidden state
        compiler_params=pltpu.CompilerParams(
            dimension_semantics=("parallel", "arbitrary")),
    )(emb, mask_bias,
      packed["emb_ln_g"], packed["emb_ln_b"],
      packed["wqkv"], packed["bqkv"], packed["wo"], packed["bo"],
      packed["ln1_g"], packed["ln1_b"], packed["w1"], packed["b1"],
      packed["w2"], packed["b2"], packed["ln2_g"], packed["ln2_b"],
      packed["pool_w"], packed["pool_b"])
    return last_hidden, pooled.reshape(B, H)


# ---------------------------------------------------------------------------
# Parameter construction (deterministic, synthetic "mini-BERT")
# ---------------------------------------------------------------------------

def init_params(key, *, vocab=100, max_pos=32, type_vocab=2, H=32, I=64, L=2):
    keys = iter(jax.random.split(key, 64))

    def w(shape):
        return jax.random.normal(next(keys), shape, jnp.float32) * 0.02

    params = {
        "word_emb": w((vocab, H)),
        "pos_emb": w((max_pos, H)),
        "type_emb": w((type_vocab, H)),
        "emb_ln_g": jnp.ones((H,), jnp.float32),
        "emb_ln_b": jnp.zeros((H,), jnp.float32),
        "pool_w": w((H, H)),
        "pool_b": jnp.zeros((H,), jnp.float32),
        "layers": [],
    }
    for _ in range(L):
        params["layers"].append({
            "wq": w((H, H)), "bq": jnp.zeros((H,), jnp.float32),
            "wk": w((H, H)), "bk": jnp.zeros((H,), jnp.float32),
            "wv": w((H, H)), "bv": jnp.zeros((H,), jnp.float32),
            "wo": w((H, H)), "bo": jnp.zeros((H,), jnp.float32),
            "ln1_g": jnp.ones((H,), jnp.float32), "ln1_b": jnp.zeros((H,), jnp.float32),
            "w1": w((H, I)), "b1": jnp.zeros((I,), jnp.float32),
            "w2": w((I, H)), "b2": jnp.zeros((H,), jnp.float32),
            "ln2_g": jnp.ones((H,), jnp.float32), "ln2_b": jnp.zeros((H,), jnp.float32),
        })
    return params


def pack_params(params, n_heads):
    """Pack HF-style weights for the fused encoder kernel (once, outside jit):
    concat Wq|Wk|Wv, fold 1/sqrt(Dh) into Wq/bq, stack per-layer weights along
    a leading L axis, cast matmul weights to bf16, keep bias/LN params in f32
    as (1, X) rows."""
    H = params["word_emb"].shape[1]
    Dh = H // n_heads
    scale = 1.0 / math.sqrt(Dh)
    layers = params["layers"]
    I = layers[0]["w1"].shape[1]
    stack = lambda f: jnp.stack([f(l) for l in layers], axis=0)

    return {
        "word_emb": params["word_emb"],
        "pos_emb": params["pos_emb"],
        "type_emb": params["type_emb"],
        "emb_ln_g": params["emb_ln_g"].reshape(1, H),
        "emb_ln_b": params["emb_ln_b"].reshape(1, H),
        "pool_w": params["pool_w"].astype(jnp.bfloat16),
        "pool_b": params["pool_b"].reshape(1, H),
        # stacked per-layer weights: leading axis = layer index
        "wqkv": stack(lambda l: jnp.concatenate(
            [l["wq"] * scale, l["wk"], l["wv"]], axis=1).astype(jnp.bfloat16)),
        "bqkv": stack(lambda l: jnp.concatenate(
            [l["bq"] * scale, l["bk"], l["bv"]]).reshape(1, 3 * H)),
        "wo": stack(lambda l: l["wo"].astype(jnp.bfloat16)),
        "bo": stack(lambda l: l["bo"].reshape(1, H)),
        "ln1_g": stack(lambda l: l["ln1_g"].reshape(1, H)),
        "ln1_b": stack(lambda l: l["ln1_b"].reshape(1, H)),
        "w1": stack(lambda l: l["w1"].astype(jnp.bfloat16)),
        "b1": stack(lambda l: l["b1"].reshape(1, I)),
        "w2": stack(lambda l: l["w2"].astype(jnp.bfloat16)),
        "b2": stack(lambda l: l["b2"].reshape(1, H)),
        "ln2_g": stack(lambda l: l["ln2_g"].reshape(1, H)),
        "ln2_b": stack(lambda l: l["ln2_b"].reshape(1, H)),
    }


# ---------------------------------------------------------------------------
# BERTBackBone forward (feature extraction)
# ---------------------------------------------------------------------------

def bert_backbone_forward(packed, input_ids, token_type_ids, attention_mask,
                          n_heads=4):
    B, S = input_ids.shape

    # Embedding gathers are JAX glue (table lookups); everything downstream
    # (emb LayerNorm, L transformer layers, pooler) runs in one fused kernel.
    emb = (packed["word_emb"][input_ids]
           + packed["pos_emb"][:S][None, :, :]
           + packed["type_emb"][token_type_ids])              # (B, S, H) f32

    # Additive attention-mask bias computed once: 0 = keep, -1e4 = pad.
    mask_bias = ((1.0 - attention_mask.astype(jnp.float32))
                 * -10000.0).reshape(B, 1, S)

    return bert_encoder(emb, mask_bias, packed, n_heads=n_heads)


# ---------------------------------------------------------------------------

if __name__ == "__main__":
    key = jax.random.PRNGKey(0)
    pkey, dkey = jax.random.split(key)

    B, S, H, NH = 2, 8, 32, 4        # small shapes: batch=2, seq=8, hidden=32
    params = init_params(pkey, H=H)
    packed = pack_params(params, n_heads=NH)

    input_ids = jax.random.randint(dkey, (B, S), 0, 100, dtype=jnp.int32)
    token_type_ids = jnp.zeros((B, S), jnp.int32)
    attention_mask = jnp.ones((B, S), jnp.int32).at[1, 6:].set(0)  # pad tail

    fwd = jax.jit(bert_backbone_forward)
    last_hidden, pooled = fwd(packed, input_ids, token_type_ids, attention_mask)
    jax.block_until_ready((last_hidden, pooled))

    assert last_hidden.shape == (B, S, H) and pooled.shape == (B, H)
    assert bool(jnp.isfinite(last_hidden).all()) and bool(jnp.isfinite(pooled).all())
    print("KERNEL_OK")
</pallas_src>

<mosaic_0001>
module attributes {stable_mosaic.version = 11 : i64} {
  func.func @_bert_encoder_kernel(%arg0: i32, %arg1: i32, %arg2: memref<1x8x32xf32, #tpu.memory_space<vmem>>, %arg3: memref<1x1x8xf32, #tpu.memory_space<vmem>>, %arg4: memref<1x32xf32, #tpu.memory_space<vmem>>, %arg5: memref<1x32xf32, #tpu.memory_space<vmem>>, %arg6: memref<1x32x96xbf16, #tpu.memory_space<vmem>>, %arg7: memref<1x1x96xf32, #tpu.memory_space<vmem>>, %arg8: memref<1x32x32xbf16, #tpu.memory_space<vmem>>, %arg9: memref<1x1x32xf32, #tpu.memory_space<vmem>>, %arg10: memref<1x1x32xf32, #tpu.memory_space<vmem>>, %arg11: memref<1x1x32xf32, #tpu.memory_space<vmem>>, %arg12: memref<1x32x64xbf16, #tpu.memory_space<vmem>>, %arg13: memref<1x1x64xf32, #tpu.memory_space<vmem>>, %arg14: memref<1x64x32xbf16, #tpu.memory_space<vmem>>, %arg15: memref<1x1x32xf32, #tpu.memory_space<vmem>>, %arg16: memref<1x1x32xf32, #tpu.memory_space<vmem>>, %arg17: memref<1x1x32xf32, #tpu.memory_space<vmem>>, %arg18: memref<32x32xbf16, #tpu.memory_space<vmem>>, %arg19: memref<1x32xf32, #tpu.memory_space<vmem>>, %arg20: memref<1x8x32xf32, #tpu.memory_space<vmem>>, %arg21: memref<1x1x32xf32, #tpu.memory_space<vmem>>, %arg22: memref<8x32xf32, #tpu.memory_space<vmem>>) attributes {dimension_semantics = [#tpu.dimension_semantics<parallel>, #tpu.dimension_semantics<arbitrary>], iteration_bounds = array<i64: 2, 2>, scalar_prefetch = 0 : i64, scratch_operands = 1 : i64, tpu.core_type = #tpu.core_type<tc>, window_params = [{transform_indices = @transform_0, window_bounds = array<i64: 1, 8, 32>}, {transform_indices = @transform_1, window_bounds = array<i64: 1, 1, 8>}, {pipeline_mode = #tpu.pipeline_mode<synchronous>, transform_indices = @transform_2, window_bounds = array<i64: 1, 32>}, {pipeline_mode = #tpu.pipeline_mode<synchronous>, transform_indices = @transform_3, window_bounds = array<i64: 1, 32>}, {transform_indices = @transform_4, window_bounds = array<i64: 1, 32, 96>}, {transform_indices = @transform_5, window_bounds = array<i64: 1, 1, 96>}, {transform_indices = @transform_6, window_bounds = array<i64: 1, 32, 32>}, {transform_indices = @transform_7, window_bounds = array<i64: 1, 1, 32>}, {transform_indices = @transform_8, window_bounds = array<i64: 1, 1, 32>}, {transform_indices = @transform_9, window_bounds = array<i64: 1, 1, 32>}, {transform_indices = @transform_10, window_bounds = array<i64: 1, 32, 64>}, {transform_indices = @transform_11, window_bounds = array<i64: 1, 1, 64>}, {transform_indices = @transform_12, window_bounds = array<i64: 1, 64, 32>}, {transform_indices = @transform_13, window_bounds = array<i64: 1, 1, 32>}, {transform_indices = @transform_14, window_bounds = array<i64: 1, 1, 32>}, {transform_indices = @transform_15, window_bounds = array<i64: 1, 1, 32>}, {pipeline_mode = #tpu.pipeline_mode<synchronous>, transform_indices = @transform_16, window_bounds = array<i64: 32, 32>}, {pipeline_mode = #tpu.pipeline_mode<synchronous>, transform_indices = @transform_17, window_bounds = array<i64: 1, 32>}, {transform_indices = @transform_18, window_bounds = array<i64: 1, 8, 32>}, {transform_indices = @transform_19, window_bounds = array<i64: 1, 1, 32>}]} {
    %c0_i32 = arith.constant 0 : i32
    %0 = arith.cmpi eq, %arg1, %c0_i32 : i32
    %1 = arith.extui %0 : i1 to i32
    %c0_i32_0 = arith.constant 0 : i32
    %2 = arith.cmpi ne, %1, %c0_i32_0 : i32
    scf.if %2 {
      %c0_82 = arith.constant 0 : index
      %c0_83 = arith.constant 0 : index
      %c0_84 = arith.constant 0 : index
      %204 = vector.load %arg2[%c0_82, %c0_83, %c0_84] : memref<1x8x32xf32, #tpu.memory_space<vmem>>, vector<1x8x32xf32>
      %205 = vector.shape_cast %204 : vector<1x8x32xf32> to vector<8x32xf32>
      %c0_85 = arith.constant 0 : index
      %c0_86 = arith.constant 0 : index
      %206 = vector.load %arg4[%c0_85, %c0_86] : memref<1x32xf32, #tpu.memory_space<vmem>>, vector<1x32xf32>
      %c0_87 = arith.constant 0 : index
      %c0_88 = arith.constant 0 : index
      %207 = vector.load %arg5[%c0_87, %c0_88] : memref<1x32xf32, #tpu.memory_space<vmem>>, vector<1x32xf32>
      %cst_89 = arith.constant dense<0.000000e+00> : vector<8xf32>
      %208 = vector.multi_reduction <add>, %205, %cst_89 [1] : vector<8x32xf32> to vector<8xf32>
      %209 = vector.shape_cast %208 : vector<8xf32> to vector<8x1xf32>
      %cst_90 = arith.constant 3.200000e+01 : f32
      %210 = vector.broadcast %cst_90 : f32 to vector<8x1xf32>
      %211 = arith.divf %209, %210 : vector<8x1xf32>
      %212 = vector.broadcast %211 : vector<8x1xf32> to vector<8x32xf32>
      %213 = arith.subf %205, %212 : vector<8x32xf32>
      %214 = arith.mulf %213, %213 : vector<8x32xf32>
      %cst_91 = arith.constant dense<0.000000e+00> : vector<8xf32>
      %215 = vector.multi_reduction <add>, %214, %cst_91 [1] : vector<8x32xf32> to vector<8xf32>
      %216 = vector.shape_cast %215 : vector<8xf32> to vector<8x1xf32>
      %cst_92 = arith.constant 3.200000e+01 : f32
      %217 = vector.broadcast %cst_92 : f32 to vector<8x1xf32>
      %218 = arith.divf %216, %217 : vector<8x1xf32>
      %219 = vector.broadcast %211 : vector<8x1xf32> to vector<8x32xf32>
      %220 = arith.subf %205, %219 : vector<8x32xf32>
      %cst_93 = arith.constant 9.99999996E-13 : f32
      %221 = vector.broadcast %cst_93 : f32 to vector<8x1xf32>
      %222 = arith.addf %218, %221 : vector<8x1xf32>
      %223 = math.rsqrt %222 : vector<8x1xf32>
      %224 = vector.broadcast %223 : vector<8x1xf32> to vector<8x32xf32>
      %225 = arith.mulf %220, %224 : vector<8x32xf32>
      %226 = vector.broadcast %206 : vector<1x32xf32> to vector<8x32xf32>
      %227 = arith.mulf %225, %226 : vector<8x32xf32>
      %228 = vector.broadcast %207 : vector<1x32xf32> to vector<8x32xf32>
      %229 = arith.addf %227, %228 : vector<8x32xf32>
      %c0_94 = arith.constant 0 : index
      %c0_95 = arith.constant 0 : index
      %230 = vector.load %arg22[%c0_94, %c0_95] : memref<8x32xf32, #tpu.memory_space<vmem>>, vector<8x32xf32>
      tpu.vector_store %arg22[%c0_94, %c0_95], %229 {strides = array<i32>} : memref<8x32xf32, #tpu.memory_space<vmem>>, vector<8x32xf32>,
    } else {
    }
    %c0 = arith.constant 0 : index
    %c0_1 = arith.constant 0 : index
    %3 = vector.load %arg22[%c0, %c0_1] : memref<8x32xf32, #tpu.memory_space<vmem>>, vector<8x32xf32>
    %4 = arith.truncf %3 : vector<8x32xf32> to vector<8x32xbf16>
    %c0_2 = arith.constant 0 : index
    %c0_3 = arith.constant 0 : index
    %c0_4 = arith.constant 0 : index
    %5 = vector.load %arg6[%c0_2, %c0_3, %c0_4] : memref<1x32x96xbf16, #tpu.memory_space<vmem>>, vector<1x32x96xbf16>
    %6 = vector.shape_cast %5 : vector<1x32x96xbf16> to vector<32x96xbf16>
    %cst = arith.constant dense<0.000000e+00> : vector<8x96xf32>
    %7 = tpu.matmul %4, %6, %cst {dimension_numbers = #tpu.dot_dimension_numbers<[1], [0], [0], [1], [0, 0, 1, 1], [], []>} : vector<8x32xbf16>, vector<32x96xbf16>, vector<8x96xf32> -> vector<8x96xf32>
    %c0_5 = arith.constant 0 : index
    %c0_6 = arith.constant 0 : index
    %c0_7 = arith.constant 0 : index
    %8 = vector.load %arg7[%c0_5, %c0_6, %c0_7] : memref<1x1x96xf32, #tpu.memory_space<vmem>>, vector<1x1x96xf32>
    %9 = vector.shape_cast %8 : vector<1x1x96xf32> to vector<1x96xf32>
    %10 = vector.broadcast %9 : vector<1x96xf32> to vector<8x96xf32>
    %11 = arith.addf %7, %10 : vector<8x96xf32>
    %12 = vector.extract_strided_slice %11 {offsets = [0, 0], sizes = [8, 32], strides = [1, 1]} : vector<8x96xf32> to vector<8x32xf32>
    %13 = vector.extract_strided_slice %11 {offsets = [0, 32], sizes = [8, 32], strides = [1, 1]} : vector<8x96xf32> to vector<8x32xf32>
    %14 = vector.extract_strided_slice %11 {offsets = [0, 64], sizes = [8, 32], strides = [1, 1]} : vector<8x96xf32> to vector<8x32xf32>
    %c0_8 = arith.constant 0 : index
    %c0_9 = arith.constant 0 : index
    %c0_10 = arith.constant 0 : index
    %15 = vector.load %arg3[%c0_8, %c0_9, %c0_10] : memref<1x1x8xf32, #tpu.memory_space<vmem>>, vector<1x1x8xf32>
    %16 = vector.shape_cast %15 : vector<1x1x8xf32> to vector<1x8xf32>
    %17 = vector.extract_strided_slice %12 {offsets = [0, 0], sizes = [8, 8], strides = [1, 1]} : vector<8x32xf32> to vector<8x8xf32>
    %18 = arith.truncf %17 : vector<8x8xf32> to vector<8x8xbf16>
    %19 = vector.extract_strided_slice %13 {offsets = [0, 0], sizes = [8, 8], strides = [1, 1]} : vector<8x32xf32> to vector<8x8xf32>
    %20 = arith.truncf %19 : vector<8x8xf32> to vector<8x8xbf16>
    %21 = vector.extract_strided_slice %14 {offsets = [0, 0], sizes = [8, 8], strides = [1, 1]} : vector<8x32xf32> to vector<8x8xf32>
    %22 = arith.truncf %21 : vector<8x8xf32> to vector<8x8xbf16>
    %cst_11 = arith.constant dense<0.000000e+00> : vector<8x8xf32>
    %23 = tpu.matmul %18, %20, %cst_11 {dimension_numbers = #tpu.dot_dimension_numbers<[1], [1], [0], [0], [0, 0, 1, 0], [], []>} : vector<8x8xbf16>, vector<8x8xbf16>, vector<8x8xf32> -> vector<8x8xf32>
    %24 = vector.broadcast %16 : vector<1x8xf32> to vector<8x8xf32>
    %25 = arith.addf %23, %24 : vector<8x8xf32>
    %cst_12 = arith.constant dense<0xFF800000> : vector<8xf32>
    %26 = vector.multi_reduction <maximumf>, %25, %cst_12 [1] : vector<8x8xf32> to vector<8xf32>
    %27 = vector.shape_cast %26 : vector<8xf32> to vector<8x1xf32>
    %28 = vector.broadcast %27 : vector<8x1xf32> to vector<8x8xf32>
    %29 = arith.subf %25, %28 : vector<8x8xf32>
    %30 = math.exp %29 : vector<8x8xf32>
    %cst_13 = arith.constant dense<0.000000e+00> : vector<8xf32>
    %31 = vector.multi_reduction <add>, %30, %cst_13 [1] : vector<8x8xf32> to vector<8xf32>
    %32 = vector.shape_cast %31 : vector<8xf32> to vector<8x1xf32>
    %33 = tpu.reciprocal %32 {approx = true} : vector<8x1xf32> -> vector<8x1xf32>
    %34 = vector.broadcast %33 : vector<8x1xf32> to vector<8x8xf32>
    %35 = arith.mulf %30, %34 : vector<8x8xf32>
    %36 = arith.truncf %35 : vector<8x8xf32> to vector<8x8xbf16>
    %cst_14 = arith.constant dense<0.000000e+00> : vector<8x8xf32>
    %37 = tpu.matmul %36, %22, %cst_14 {dimension_numbers = #tpu.dot_dimension_numbers<[1], [0], [0], [1], [0, 0, 1, 1], [], []>} : vector<8x8xbf16>, vector<8x8xbf16>, vector<8x8xf32> -> vector<8x8xf32>
    %38 = vector.extract_strided_slice %12 {offsets = [0, 8], sizes = [8, 8], strides = [1, 1]} : vector<8x32xf32> to vector<8x8xf32>
    %39 = arith.truncf %38 : vector<8x8xf32> to vector<8x8xbf16>
    %40 = vector.extract_strided_slice %13 {offsets = [0, 8], sizes = [8, 8], strides = [1, 1]} : vector<8x32xf32> to vector<8x8xf32>
    %41 = arith.truncf %40 : vector<8x8xf32> to vector<8x8xbf16>
    %42 = vector.extract_strided_slice %14 {offsets = [0, 8], sizes = [8, 8], strides = [1, 1]} : vector<8x32xf32> to vector<8x8xf32>
    %43 = arith.truncf %42 : vector<8x8xf32> to vector<8x8xbf16>
    %cst_15 = arith.constant dense<0.000000e+00> : vector<8x8xf32>
    %44 = tpu.matmul %39, %41, %cst_15 {dimension_numbers = #tpu.dot_dimension_numbers<[1], [1], [0], [0], [0, 0, 1, 0], [], []>} : vector<8x8xbf16>, vector<8x8xbf16>, vector<8x8xf32> -> vector<8x8xf32>
    %45 = vector.broadcast %16 : vector<1x8xf32> to vector<8x8xf32>
    %46 = arith.addf %44, %45 : vector<8x8xf32>
    %cst_16 = arith.constant dense<0xFF800000> : vector<8xf32>
    %47 = vector.multi_reduction <maximumf>, %46, %cst_16 [1] : vector<8x8xf32> to vector<8xf32>
    %48 = vector.shape_cast %47 : vector<8xf32> to vector<8x1xf32>
    %49 = vector.broadcast %48 : vector<8x1xf32> to vector<8x8xf32>
    %50 = arith.subf %46, %49 : vector<8x8xf32>
    %51 = math.exp %50 : vector<8x8xf32>
    %cst_17 = arith.constant dense<0.000000e+00> : vector<8xf32>
    %52 = vector.multi_reduction <add>, %51, %cst_17 [1] : vector<8x8xf32> to vector<8xf32>
    %53 = vector.shape_cast %52 : vector<8xf32> to vector<8x1xf32>
    %54 = tpu.reciprocal %53 {approx = true} : vector<8x1xf32> -> vector<8x1xf32>
    %55 = vector.broadcast %54 : vector<8x1xf32> to vector<8x8xf32>
    %56 = arith.mulf %51, %55 : vector<8x8xf32>
    %57 = arith.truncf %56 : vector<8x8xf32> to vector<8x8xbf16>
    %cst_18 = arith.constant dense<0.000000e+00> : vector<8x8xf32>
    %58 = tpu.matmul %57, %43, %cst_18 {dimension_numbers = #tpu.dot_dimension_numbers<[1], [0], [0], [1], [0, 0, 1, 1], [], []>} : vector<8x8xbf16>, vector<8x8xbf16>, vector<8x8xf32> -> vector<8x8xf32>
    %59 = vector.extract_strided_slice %12 {offsets = [0, 16], sizes = [8, 8], strides = [1, 1]} : vector<8x32xf32> to vector<8x8xf32>
    %60 = arith.truncf %59 : vector<8x8xf32> to vector<8x8xbf16>
    %61 = vector.extract_strided_slice %13 {offsets = [0, 16], sizes = [8, 8], strides = [1, 1]} : vector<8x32xf32> to vector<8x8xf32>
    %62 = arith.truncf %61 : vector<8x8xf32> to vector<8x8xbf16>
    %63 = vector.extract_strided_slice %14 {offsets = [0, 16], sizes = [8, 8], strides = [1, 1]} : vector<8x32xf32> to vector<8x8xf32>
    %64 = arith.truncf %63 : vector<8x8xf32> to vector<8x8xbf16>
    %cst_19 = arith.constant dense<0.000000e+00> : vector<8x8xf32>
    %65 = tpu.matmul %60, %62, %cst_19 {dimension_numbers = #tpu.dot_dimension_numbers<[1], [1], [0], [0], [0, 0, 1, 0], [], []>} : vector<8x8xbf16>, vector<8x8xbf16>, vector<8x8xf32> -> vector<8x8xf32>
    %66 = vector.broadcast %16 : vector<1x8xf32> to vector<8x8xf32>
    %67 = arith.addf %65, %66 : vector<8x8xf32>
    %cst_20 = arith.constant dense<0xFF800000> : vector<8xf32>
    %68 = vector.multi_reduction <maximumf>, %67, %cst_20 [1] : vector<8x8xf32> to vector<8xf32>
    %69 = vector.shape_cast %68 : vector<8xf32> to vector<8x1xf32>
    %70 = vector.broadcast %69 : vector<8x1xf32> to vector<8x8xf32>
    %71 = arith.subf %67, %70 : vector<8x8xf32>
    %72 = math.exp %71 : vector<8x8xf32>
    %cst_21 = arith.constant dense<0.000000e+00> : vector<8xf32>
    %73 = vector.multi_reduction <add>, %72, %cst_21 [1] : vector<8x8xf32> to vector<8xf32>
    %74 = vector.shape_cast %73 : vector<8xf32> to vector<8x1xf32>
    %75 = tpu.reciprocal %74 {approx = true} : vector<8x1xf32> -> vector<8x1xf32>
    %76 = vector.broadcast %75 : vector<8x1xf32> to vector<8x8xf32>
    %77 = arith.mulf %72, %76 : vector<8x8xf32>
    %78 = arith.truncf %77 : vector<8x8xf32> to vector<8x8xbf16>
    %cst_22 = arith.constant dense<0.000000e+00> : vector<8x8xf32>
    %79 = tpu.matmul %78, %64, %cst_22 {dimension_numbers = #tpu.dot_dimension_numbers<[1], [0], [0], [1], [0, 0, 1, 1], [], []>} : vector<8x8xbf16>, vector<8x8xbf16>, vector<8x8xf32> -> vector<8x8xf32>
    %80 = vector.extract_strided_slice %12 {offsets = [0, 24], sizes = [8, 8], strides = [1, 1]} : vector<8x32xf32> to vector<8x8xf32>
    %81 = arith.truncf %80 : vector<8x8xf32> to vector<8x8xbf16>
    %82 = vector.extract_strided_slice %13 {offsets = [0, 24], sizes = [8, 8], strides = [1, 1]} : vector<8x32xf32> to vector<8x8xf32>
    %83 = arith.truncf %82 : vector<8x8xf32> to vector<8x8xbf16>
    %84 = vector.extract_strided_slice %14 {offsets = [0, 24], sizes = [8, 8], strides = [1, 1]} : vector<8x32xf32> to vector<8x8xf32>
    %85 = arith.truncf %84 : vector<8x8xf32> to vector<8x8xbf16>
    %cst_23 = arith.constant dense<0.000000e+00> : vector<8x8xf32>
    %86 = tpu.matmul %81, %83, %cst_23 {dimension_numbers = #tpu.dot_dimension_numbers<[1], [1], [0], [0], [0, 0, 1, 0], [], []>} : vector<8x8xbf16>, vector<8x8xbf16>, vector<8x8xf32> -> vector<8x8xf32>
    %87 = vector.broadcast %16 : vector<1x8xf32> to vector<8x8xf32>
    %88 = arith.addf %86, %87 : vector<8x8xf32>
    %cst_24 = arith.constant dense<0xFF800000> : vector<8xf32>
    %89 = vector.multi_reduction <maximumf>, %88, %cst_24 [1] : vector<8x8xf32> to vector<8xf32>
    %90 = vector.shape_cast %89 : vector<8xf32> to vector<8x1xf32>
    %91 = vector.broadcast %90 : vector<8x1xf32> to vector<8x8xf32>
    %92 = arith.subf %88, %91 : vector<8x8xf32>
    %93 = math.exp %92 : vector<8x8xf32>
    %cst_25 = arith.constant dense<0.000000e+00> : vector<8xf32>
    %94 = vector.multi_reduction <add>, %93, %cst_25 [1] : vector<8x8xf32> to vector<8xf32>
    %95 = vector.shape_cast %94 : vector<8xf32> to vector<8x1xf32>
    %96 = tpu.reciprocal %95 {approx = true} : vector<8x1xf32> -> vector<8x1xf32>
    %97 = vector.broadcast %96 : vector<8x1xf32> to vector<8x8xf32>
    %98 = arith.mulf %93, %97 : vector<8x8xf32>
    %99 = arith.truncf %98 : vector<8x8xf32> to vector<8x8xbf16>
    %cst_26 = arith.constant dense<0.000000e+00> : vector<8x8xf32>
    %100 = tpu.matmul %99, %85, %cst_26 {dimension_numbers = #tpu.dot_dimension_numbers<[1], [0], [0], [1], [0, 0, 1, 1], [], []>} : vector<8x8xbf16>, vector<8x8xbf16>, vector<8x8xf32> -> vector<8x8xf32>
    %101 = tpu.concatenate %37, %58, %79, %100 in 1 : vector<8x8xf32>, vector<8x8xf32>, vector<8x8xf32>, vector<8x8xf32> -> vector<8x32xf32>
    %102 = arith.truncf %101 : vector<8x32xf32> to vector<8x32xbf16>
    %c0_27 = arith.constant 0 : index
    %c0_28 = arith.constant 0 : index
    %c0_29 = arith.constant 0 : index
    %103 = vector.load %arg8[%c0_27, %c0_28, %c0_29] : memref<1x32x32xbf16, #tpu.memory_space<vmem>>, vector<1x32x32xbf16>
    %104 = vector.shape_cast %103 : vector<1x32x32xbf16> to vector<32x32xbf16>
    %cst_30 = arith.constant dense<0.000000e+00> : vector<8x32xf32>
    %105 = tpu.matmul %102, %104, %cst_30 {dimension_numbers = #tpu.dot_dimension_numbers<[1], [0], [0], [1], [0, 0, 1, 1], [], []>} : vector<8x32xbf16>, vector<32x32xbf16>, vector<8x32xf32> -> vector<8x32xf32>
    %c0_31 = arith.constant 0 : index
    %c0_32 = arith.constant 0 : index
    %c0_33 = arith.constant 0 : index
    %106 = vector.load %arg9[%c0_31, %c0_32, %c0_33] : memref<1x1x32xf32, #tpu.memory_space<vmem>>, vector<1x1x32xf32>
    %107 = vector.shape_cast %106 : vector<1x1x32xf32> to vector<1x32xf32>
    %108 = vector.broadcast %107 : vector<1x32xf32> to vector<8x32xf32>
    %109 = arith.addf %105, %108 : vector<8x32xf32>
    %110 = arith.addf %109, %3 : vector<8x32xf32>
    %c0_34 = arith.constant 0 : index
    %c0_35 = arith.constant 0 : index
    %c0_36 = arith.constant 0 : index
    %111 = vector.load %arg10[%c0_34, %c0_35, %c0_36] : memref<1x1x32xf32, #tpu.memory_space<vmem>>, vector<1x1x32xf32>
    %112 = vector.shape_cast %111 : vector<1x1x32xf32> to vector<1x32xf32>
    %c0_37 = arith.constant 0 : index
    %c0_38 = arith.constant 0 : index
    %c0_39 = arith.constant 0 : index
    %113 = vector.load %arg11[%c0_37, %c0_38, %c0_39] : memref<1x1x32xf32, #tpu.memory_space<vmem>>, vector<1x1x32xf32>
    %114 = vector.shape_cast %113 : vector<1x1x32xf32> to vector<1x32xf32>
    %cst_40 = arith.constant dense<0.000000e+00> : vector<8xf32>
    %115 = vector.multi_reduction <add>, %110, %cst_40 [1] : vector<8x32xf32> to vector<8xf32>
    %116 = vector.shape_cast %115 : vector<8xf32> to vector<8x1xf32>
    %cst_41 = arith.constant 3.200000e+01 : f32
    %117 = vector.broadcast %cst_41 : f32 to vector<8x1xf32>
    %118 = arith.divf %116, %117 : vector<8x1xf32>
    %119 = vector.broadcast %118 : vector<8x1xf32> to vector<8x32xf32>
    %120 = arith.subf %110, %119 : vector<8x32xf32>
    %121 = arith.mulf %120, %120 : vector<8x32xf32>
    %cst_42 = arith.constant dense<0.000000e+00> : vector<8xf32>
    %122 = vector.multi_reduction <add>, %121, %cst_42 [1] : vector<8x32xf32> to vector<8xf32>
    %123 = vector.shape_cast %122 : vector<8xf32> to vector<8x1xf32>
    %cst_43 = arith.constant 3.200000e+01 : f32
    %124 = vector.broadcast %cst_43 : f32 to vector<8x1xf32>
    %125 = arith.divf %123, %124 : vector<8x1xf32>
    %126 = vector.broadcast %118 : vector<8x1xf32> to vector<8x32xf32>
    %127 = arith.subf %110, %126 : vector<8x32xf32>
    %cst_44 = arith.constant 9.99999996E-13 : f32
    %128 = vector.broadcast %cst_44 : f32 to vector<8x1xf32>
    %129 = arith.addf %125, %128 : vector<8x1xf32>
    %130 = math.rsqrt %129 : vector<8x1xf32>
    %131 = vector.broadcast %130 : vector<8x1xf32> to vector<8x32xf32>
    %132 = arith.mulf %127, %131 : vector<8x32xf32>
    %133 = vector.broadcast %112 : vector<1x32xf32> to vector<8x32xf32>
    %134 = arith.mulf %132, %133 : vector<8x32xf32>
    %135 = vector.broadcast %114 : vector<1x32xf32> to vector<8x32xf32>
    %136 = arith.addf %134, %135 : vector<8x32xf32>
    %137 = arith.truncf %136 : vector<8x32xf32> to vector<8x32xbf16>
    %c0_45 = arith.constant 0 : index
    %c0_46 = arith.constant 0 : index
    %c0_47 = arith.constant 0 : index
    %138 = vector.load %arg12[%c0_45, %c0_46, %c0_47] : memref<1x32x64xbf16, #tpu.memory_space<vmem>>, vector<1x32x64xbf16>
    %139 = vector.shape_cast %138 : vector<1x32x64xbf16> to vector<32x64xbf16>
    %cst_48 = arith.constant dense<0.000000e+00> : vector<8x64xf32>
    %140 = tpu.matmul %137, %139, %cst_48 {dimension_numbers = #tpu.dot_dimension_numbers<[1], [0], [0], [1], [0, 0, 1, 1], [], []>} : vector<8x32xbf16>, vector<32x64xbf16>, vector<8x64xf32> -> vector<8x64xf32>
    %c0_49 = arith.constant 0 : index
    %c0_50 = arith.constant 0 : index
    %c0_51 = arith.constant 0 : index
    %141 = vector.load %arg13[%c0_49, %c0_50, %c0_51] : memref<1x1x64xf32, #tpu.memory_space<vmem>>, vector<1x1x64xf32>
    %142 = vector.shape_cast %141 : vector<1x1x64xf32> to vector<1x64xf32>
    %143 = vector.broadcast %142 : vector<1x64xf32> to vector<8x64xf32>
    %144 = arith.addf %140, %143 : vector<8x64xf32>
    %145 = arith.mulf %144, %144 : vector<8x64xf32>
    %146 = arith.mulf %144, %145 : vector<8x64xf32>
    %cst_52 = arith.constant 4.471500e-02 : f32
    %147 = vector.broadcast %cst_52 : f32 to vector<8x64xf32>
    %148 = arith.mulf %147, %146 : vector<8x64xf32>
    %149 = arith.addf %144, %148 : vector<8x64xf32>
    %cst_53 = arith.constant 0.797884583 : f32
    %150 = vector.broadcast %cst_53 : f32 to vector<8x64xf32>
    %151 = arith.mulf %150, %149 : vector<8x64xf32>
    %152 = math.tanh %151 : vector<8x64xf32>
    %cst_54 = arith.constant 1.000000e+00 : f32
    %153 = vector.broadcast %cst_54 : f32 to vector<8x64xf32>
    %154 = arith.addf %153, %152 : vector<8x64xf32>
    %cst_55 = arith.constant 5.000000e-01 : f32
    %155 = vector.broadcast %cst_55 : f32 to vector<8x64xf32>
    %156 = arith.mulf %155, %154 : vector<8x64xf32>
    %157 = arith.mulf %144, %156 : vector<8x64xf32>
    %158 = arith.truncf %157 : vector<8x64xf32> to vector<8x64xbf16>
    %c0_56 = arith.constant 0 : index
    %c0_57 = arith.constant 0 : index
    %c0_58 = arith.constant 0 : index
    %159 = vector.load %arg14[%c0_56, %c0_57, %c0_58] : memref<1x64x32xbf16, #tpu.memory_space<vmem>>, vector<1x64x32xbf16>
    %160 = vector.shape_cast %159 : vector<1x64x32xbf16> to vector<64x32xbf16>
    %cst_59 = arith.constant dense<0.000000e+00> : vector<8x32xf32>
    %161 = tpu.matmul %158, %160, %cst_59 {dimension_numbers = #tpu.dot_dimension_numbers<[1], [0], [0], [1], [0, 0, 1, 1], [], []>} : vector<8x64xbf16>, vector<64x32xbf16>, vector<8x32xf32> -> vector<8x32xf32>
    %c0_60 = arith.constant 0 : index
    %c0_61 = arith.constant 0 : index
    %c0_62 = arith.constant 0 : index
    %162 = vector.load %arg15[%c0_60, %c0_61, %c0_62] : memref<1x1x32xf32, #tpu.memory_space<vmem>>, vector<1x1x32xf32>
    %163 = vector.shape_cast %162 : vector<1x1x32xf32> to vector<1x32xf32>
    %164 = vector.broadcast %163 : vector<1x32xf32> to vector<8x32xf32>
    %165 = arith.addf %161, %164 : vector<8x32xf32>
    %166 = arith.addf %165, %136 : vector<8x32xf32>
    %c0_63 = arith.constant 0 : index
    %c0_64 = arith.constant 0 : index
    %c0_65 = arith.constant 0 : index
    %167 = vector.load %arg16[%c0_63, %c0_64, %c0_65] : memref<1x1x32xf32, #tpu.memory_space<vmem>>, vector<1x1x32xf32>
    %168 = vector.shape_cast %167 : vector<1x1x32xf32> to vector<1x32xf32>
    %c0_66 = arith.constant 0 : index
    %c0_67 = arith.constant 0 : index
    %c0_68 = arith.constant 0 : index
    %169 = vector.load %arg17[%c0_66, %c0_67, %c0_68] : memref<1x1x32xf32, #tpu.memory_space<vmem>>, vector<1x1x32xf32>
    %170 = vector.shape_cast %169 : vector<1x1x32xf32> to vector<1x32xf32>
    %cst_69 = arith.constant dense<0.000000e+00> : vector<8xf32>
    %171 = vector.multi_reduction <add>, %166, %cst_69 [1] : vector<8x32xf32> to vector<8xf32>
    %172 = vector.shape_cast %171 : vector<8xf32> to vector<8x1xf32>
    %cst_70 = arith.constant 3.200000e+01 : f32
    %173 = vector.broadcast %cst_70 : f32 to vector<8x1xf32>
    %174 = arith.divf %172, %173 : vector<8x1xf32>
    %175 = vector.broadcast %174 : vector<8x1xf32> to vector<8x32xf32>
    %176 = arith.subf %166, %175 : vector<8x32xf32>
    %177 = arith.mulf %176, %176 : vector<8x32xf32>
    %cst_71 = arith.constant dense<0.000000e+00> : vector<8xf32>
    %178 = vector.multi_reduction <add>, %177, %cst_71 [1] : vector<8x32xf32> to vector<8xf32>
    %179 = vector.shape_cast %178 : vector<8xf32> to vector<8x1xf32>
    %cst_72 = arith.constant 3.200000e+01 : f32
    %180 = vector.broadcast %cst_72 : f32 to vector<8x1xf32>
    %181 = arith.divf %179, %180 : vector<8x1xf32>
    %182 = vector.broadcast %174 : vector<8x1xf32> to vector<8x32xf32>
    %183 = arith.subf %166, %182 : vector<8x32xf32>
    %cst_73 = arith.constant 9.99999996E-13 : f32
    %184 = vector.broadcast %cst_73 : f32 to vector<8x1xf32>
    %185 = arith.addf %181, %184 : vector<8x1xf32>
    %186 = math.rsqrt %185 : vector<8x1xf32>
    %187 = vector.broadcast %186 : vector<8x1xf32> to vector<8x32xf32>
    %188 = arith.mulf %183, %187 : vector<8x32xf32>
    %189 = vector.broadcast %168 : vector<1x32xf32> to vector<8x32xf32>
    %190 = arith.mulf %188, %189 : vector<8x32xf32>
    %191 = vector.broadcast %170 : vector<1x32xf32> to vector<8x32xf32>
    %192 = arith.addf %190, %191 : vector<8x32xf32>
    %c0_74 = arith.constant 0 : index
    %c0_75 = arith.constant 0 : index
    %193 = vector.load %arg22[%c0_74, %c0_75] : memref<8x32xf32, #tpu.memory_space<vmem>>, vector<8x32xf32>
    tpu.vector_store %arg22[%c0_74, %c0_75], %192 {strides = array<i32>} : memref<8x32xf32, #tpu.memory_space<vmem>>, vector<8x32xf32>,
    %194 = vector.extract_strided_slice %192 {offsets = [0, 0], sizes = [1, 32], strides = [1, 1]} : vector<8x32xf32> to vector<1x32xf32>
    %195 = arith.truncf %194 : vector<1x32xf32> to vector<1x32xbf16>
    %c0_76 = arith.constant 0 : index
    %c0_77 = arith.constant 0 : index
    %196 = vector.load %arg18[%c0_76, %c0_77] : memref<32x32xbf16, #tpu.memory_space<vmem>>, vector<32x32xbf16>
    %cst_78 = arith.constant dense<0.000000e+00> : vector<1x32xf32>
    %197 = tpu.matmul %195, %196, %cst_78 {dimension_numbers = #tpu.dot_dimension_numbers<[1], [0], [0], [1], [0, 0, 1, 1], [], []>} : vector<1x32xbf16>, vector<32x32xbf16>, vector<1x32xf32> -> vector<1x32xf32>
    %c0_79 = arith.constant 0 : index
    %c0_80 = arith.constant 0 : index
    %198 = vector.load %arg19[%c0_79, %c0_80] : memref<1x32xf32, #tpu.memory_space<vmem>>, vector<1x32xf32>
    %199 = arith.addf %197, %198 : vector<1x32xf32>
    %200 = math.tanh %199 : vector<1x32xf32>
    %c1_i32 = arith.constant 1 : i32
    %201 = arith.cmpi eq, %arg1, %c1_i32 : i32
    %202 = arith.extui %201 : i1 to i32
    %c0_i32_81 = arith.constant 0 : i32
    %203 = arith.cmpi ne, %202, %c0_i32_81 : i32
    scf.if %203 {
      %204 = vector.shape_cast %192 : vector<8x32xf32> to vector<1x8x32xf32>
      %c0_82 = arith.constant 0 : index
      %c0_83 = arith.constant 0 : index
      %c0_84 = arith.constant 0 : index
      %205 = vector.load %arg20[%c0_82, %c0_83, %c0_84] : memref<1x8x32xf32, #tpu.memory_space<vmem>>, vector<1x8x32xf32>
      tpu.vector_store %arg20[%c0_82, %c0_83, %c0_84], %204 {strides = array<i32>} : memref<1x8x32xf32, #tpu.memory_space<vmem>>, vector<1x8x32xf32>,
      %206 = vector.shape_cast %200 : vector<1x32xf32> to vector<1x1x32xf32>
      %c0_85 = arith.constant 0 : index
      %c0_86 = arith.constant 0 : index
      %c0_87 = arith.constant 0 : index
      %207 = vector.load %arg21[%c0_85, %c0_86, %c0_87] : memref<1x1x32xf32, #tpu.memory_space<vmem>>, vector<1x1x32xf32>
      tpu.vector_store %arg21[%c0_85, %c0_86, %c0_87], %206 {strides = array<i32>} : memref<1x1x32xf32, #tpu.memory_space<vmem>>, vector<1x1x32xf32>,
    } else {
    }
    return
  }
  func.func @transform_0(%arg0: i32, %arg1: i32) -> (i32, i32, i32) {
    %c0_i32 = arith.constant 0 : i32
    %c0_i32_0 = arith.constant 0 : i32
    %c0_i32_1 = arith.constant 0 : i32
    return %arg0, %c0_i32, %c0_i32_0 : i32, i32, i32
  }
  func.func @transform_1(%arg0: i32, %arg1: i32) -> (i32, i32, i32) {
    %c0_i32 = arith.constant 0 : i32
    %c0_i32_0 = arith.constant 0 : i32
    %c0_i32_1 = arith.constant 0 : i32
    return %arg0, %c0_i32, %c0_i32_0 : i32, i32, i32
  }
  func.func @transform_2(%arg0: i32, %arg1: i32) -> (i32, i32) {
    %c0_i32 = arith.constant 0 : i32
    %c0_i32_0 = arith.constant 0 : i32
    %c0_i32_1 = arith.constant 0 : i32
    return %c0_i32, %c0_i32_0 : i32, i32
  }
  func.func @transform_3(%arg0: i32, %arg1: i32) -> (i32, i32) {
    %c0_i32 = arith.constant 0 : i32
    %c0_i32_0 = arith.constant 0 : i32
    %c0_i32_1 = arith.constant 0 : i32
    return %c0_i32, %c0_i32_0 : i32, i32
  }
  func.func @transform_4(%arg0: i32, %arg1: i32) -> (i32, i32, i32) {
    %c0_i32 = arith.constant 0 : i32
    %c0_i32_0 = arith.constant 0 : i32
    %c0_i32_1 = arith.constant 0 : i32
    return %arg1, %c0_i32, %c0_i32_0 : i32, i32, i32
  }
  func.func @transform_5(%arg0: i32, %arg1: i32) -> (i32, i32, i32) {
    %c0_i32 = arith.constant 0 : i32
    %c0_i32_0 = arith.constant 0 : i32
    %c0_i32_1 = arith.constant 0 : i32
    return %arg1, %c0_i32, %c0_i32_0 : i32, i32, i32
  }
  func.func @transform_6(%arg0: i32, %arg1: i32) -> (i32, i32, i32) {
    %c0_i32 = arith.constant 0 : i32
    %c0_i32_0 = arith.constant 0 : i32
    %c0_i32_1 = arith.constant 0 : i32
    return %arg1, %c0_i32, %c0_i32_0 : i32, i32, i32
  }
  func.func @transform_7(%arg0: i32, %arg1: i32) -> (i32, i32, i32) {
    %c0_i32 = arith.constant 0 : i32
    %c0_i32_0 = arith.constant 0 : i32
    %c0_i32_1 = arith.constant 0 : i32
    return %arg1, %c0_i32, %c0_i32_0 : i32, i32, i32
  }
  func.func @transform_8(%arg0: i32, %arg1: i32) -> (i32, i32, i32) {
    %c0_i32 = arith.constant 0 : i32
    %c0_i32_0 = arith.constant 0 : i32
    %c0_i32_1 = arith.constant 0 : i32
    return %arg1, %c0_i32, %c0_i32_0 : i32, i32, i32
  }
  func.func @transform_9(%arg0: i32, %arg1: i32) -> (i32, i32, i32) {
    %c0_i32 = arith.constant 0 : i32
    %c0_i32_0 = arith.constant 0 : i32
    %c0_i32_1 = arith.constant 0 : i32
    return %arg1, %c0_i32, %c0_i32_0 : i32, i32, i32
  }
  func.func @transform_10(%arg0: i32, %arg1: i32) -> (i32, i32, i32) {
    %c0_i32 = arith.constant 0 : i32
    %c0_i32_0 = arith.constant 0 : i32
    %c0_i32_1 = arith.constant 0 : i32
    return %arg1, %c0_i32, %c0_i32_0 : i32, i32, i32
  }
  func.func @transform_11(%arg0: i32, %arg1: i32) -> (i32, i32, i32) {
    %c0_i32 = arith.constant 0 : i32
    %c0_i32_0 = arith.constant 0 : i32
    %c0_i32_1 = arith.constant 0 : i32
    return %arg1, %c0_i32, %c0_i32_0 : i32, i32, i32
  }
  func.func @transform_12(%arg0: i32, %arg1: i32) -> (i32, i32, i32) {
    %c0_i32 = arith.constant 0 : i32
    %c0_i32_0 = arith.constant 0 : i32
    %c0_i32_1 = arith.constant 0 : i32
    return %arg1, %c0_i32, %c0_i32_0 : i32, i32, i32
  }
  func.func @transform_13(%arg0: i32, %arg1: i32) -> (i32, i32, i32) {
    %c0_i32 = arith.constant 0 : i32
    %c0_i32_0 = arith.constant 0 : i32
    %c0_i32_1 = arith.constant 0 : i32
    return %arg1, %c0_i32, %c0_i32_0 : i32, i32, i32
  }
  func.func @transform_14(%arg0: i32, %arg1: i32) -> (i32, i32, i32) {
    %c0_i32 = arith.constant 0 : i32
    %c0_i32_0 = arith.constant 0 : i32
    %c0_i32_1 = arith.constant 0 : i32
    return %arg1, %c0_i32, %c0_i32_0 : i32, i32, i32
  }
  func.func @transform_15(%arg0: i32, %arg1: i32) -> (i32, i32, i32) {
    %c0_i32 = arith.constant 0 : i32
    %c0_i32_0 = arith.constant 0 : i32
    %c0_i32_1 = arith.constant 0 : i32
    return %arg1, %c0_i32, %c0_i32_0 : i32, i32, i32
  }
  func.func @transform_16(%arg0: i32, %arg1: i32) -> (i32, i32) {
    %c0_i32 = arith.constant 0 : i32
    %c0_i32_0 = arith.constant 0 : i32
    %c0_i32_1 = arith.constant 0 : i32
    return %c0_i32, %c0_i32_0 : i32, i32
  }
  func.func @transform_17(%arg0: i32, %arg1: i32) -> (i32, i32) {
    %c0_i32 = arith.constant 0 : i32
    %c0_i32_0 = arith.constant 0 : i32
    %c0_i32_1 = arith.constant 0 : i32
    return %c0_i32, %c0_i32_0 : i32, i32
  }
  func.func @transform_18(%arg0: i32, %arg1: i32) -> (i32, i32, i32) {
    %c0_i32 = arith.constant 0 : i32
    %c0_i32_0 = arith.constant 0 : i32
    %c0_i32_1 = arith.constant 0 : i32
    return %arg0, %c0_i32, %c0_i32_0 : i32, i32, i32
  }
  func.func @transform_19(%arg0: i32, %arg1: i32) -> (i32, i32, i32) {
    %c0_i32 = arith.constant 0 : i32
    %c0_i32_0 = arith.constant 0 : i32
    %c0_i32_1 = arith.constant 0 : i32
    return %arg0, %c0_i32, %c0_i32_0 : i32, i32, i32
  }
}

</mosaic_0001>

<bundles_post_ra>
// kernel: bert_backbone_forward.1
= control target key start
LH: loop header
LB: loop body
LE: loop exit
PB: predicated region body
PF: predicated region fallthrough
CT: control target
= control target key end

     0   :  { %s2981_s0 = inlined_call_operand.vmem [shape: f32[2,8,32], index: 0, kind: input, shape index: {}]   ;;  %s2982_s1 = inlined_call_operand.vmem [shape: f32[2,1,8], index: 1, kind: input, shape index: {}]   ;;  %s2983_s2 = inlined_call_operand.vmem [shape: f32[1,32], index: 2, kind: input, shape index: {}]   ;;  %s2984_s3 = inlined_call_operand.vmem [shape: f32[1,32], index: 3, kind: input, shape index: {}]   ;;  %s2985_s4 = inlined_call_operand.vmem [shape: bf16[2,32,96], index: 4, kind: input, shape index: {}]   ;;  %s2986_s5 = inlined_call_operand.vmem [shape: f32[2,1,96], index: 5, kind: input, shape index: {}]   ;;  %s2987_s6 = inlined_call_operand.vmem [shape: bf16[2,32,32], index: 6, kind: input, shape index: {}]   ;;  %s2988_s7 = inlined_call_operand.vmem [shape: f32[2,1,32], index: 7, kind: input, shape index: {}]   ;;  %s2989_s8 = inlined_call_operand.vmem [shape: f32[2,1,32], index: 8, kind: input, shape index: {}]   ;;  %s2990_s9 = inlined_call_operand.vmem [shape: f32[2,1,32], index: 9, kind: input, shape index: {}]   ;;  %s2991_s10 = inlined_call_operand.vmem [shape: bf16[2,32,64], index: 10, kind: input, shape index: {}]   ;;  %s2992_s11 = inlined_call_operand.vmem [shape: f32[2,1,64], index: 11, kind: input, shape index: {}]   ;;  %s2993_s12 = inlined_call_operand.vmem [shape: bf16[2,64,32], index: 12, kind: input, shape index: {}]   ;;  %s2994_s13 = inlined_call_operand.vmem [shape: f32[2,1,32], index: 13, kind: input, shape index: {}]   ;;  %s2995_s14 = inlined_call_operand.vmem [shape: f32[2,1,32], index: 14, kind: input, shape index: {}]   ;;  %s2996_s15 = inlined_call_operand.vmem [shape: f32[2,1,32], index: 15, kind: input, shape index: {}]   ;;  %s2997_s16 = inlined_call_operand.vmem [shape: bf16[32,32], index: 16, kind: input, shape index: {}]   ;;  %s2998_s17 = inlined_call_operand.vmem [shape: f32[1,32], index: 17, kind: input, shape index: {}]   ;;  %s2999_s18 = inlined_call_operand.hbm [shape: f32[2,8,32], index: 18, kind: output, shape index: {0}]   ;;  %s3000_s19 = inlined_call_operand.hbm [shape: f32[2,1,32], index: 19, kind: output, shape index: {1}]  }
   0x1   :  { %3018 = sst [smem:[#allocation22_spill]] %s2981_s0 }
   0x2   :  { %3019 = sst [smem:[#allocation23_spill]] %s2982_s1 }
   0x3   :  { %3020 = sst [smem:[#allocation24_spill]] %s2983_s2 }
   0x4   :  { %3021 = sst [smem:[#allocation25_spill]] %s2984_s3 }
   0x5   :  { %3022 = sst [smem:[#allocation26_spill]] %s2985_s4 }
   0x6   :  { %3023 = sst [smem:[#allocation27_spill]] %s2987_s6 }
   0x7   :  { %3024 = sst [smem:[#allocation28_spill]] %s2989_s8 }
   0x8   :  { %3025 = sst [smem:[#allocation29_spill]] %s2990_s9 }
   0x9   :  { %3026 = sst [smem:[#allocation30_spill]] %s2991_s10 }
   0xa   :  { %3027 = sst [smem:[#allocation31_spill]] %s2993_s12 }
   0xb   :  { %3028 = sst [smem:[#allocation32_spill]] %s2995_s14 }
   0xc   :  { %3029 = sst [smem:[#allocation33_spill]] %s2996_s15 }
   0xd   :  { %3030 = sst [smem:[#allocation34_spill]] %s2997_s16 }
   0xe   :  { %3031 = sst [smem:[#allocation35_spill]] %s2998_s17 }
   0xf   :  { %3032 = sst [smem:[#allocation36_spill]] %s2999_s18 }
  0x10   :  { %3033 = sst [smem:[#allocation37_spill]] %s3000_s19 }
  0x11   :  { %25 = vsyncpa [#allocation4], 0 }
  0x12   :  { %27 = vsyncpa [#allocation4 + $0x1], 0 }
  0x13   :  { %28 = vsyncpa [#allocation6], 0 }
  0x14   :  { %30 = vsyncpa [#allocation6 + $0x1], 0  ;;  %s2578_s0 = smov 0   ;;  %s2580_s30 = smov 0  }
  0x15   :  { %s2582_s20 = smov 0   ;;  %s2584_s21 = smov 0  }
  0x16   :  { %s2586_s1 = smov 0   ;;  %s2588_s22 = smov 0  }
  0x17   :  { %s2590_s2 = smov 0   ;;  %s2592_s23 = smov 0  }
  0x18 LB: > { %3034 = sst [smem:[#allocation9_spill]] %s2430_s0  ;;  %s2015_s24 = sadd.s32 4294967295, %s2458_s23   ;;  %s2458_s23 = sphi %s2592_s23, %s36_s23   ;;  %s2454_s2 = sphi %s2590_s2, %s3091_s2   ;;  %s2450_s22 = sphi %s2588_s22, %s3090_s22   ;;  %s2446_s1 = sphi %s2586_s1, %s3089_s1   ;;  %s2442_s21 = sphi %s2584_s21, %s3088_s21   ;;  %s2438_s20 = sphi %s2582_s20, %s3087_s20   ;;  %s2434_s30 = sphi %s2580_s30, %s3086_s30   ;;  %s2430_s0 = sphi %s2578_s0, %s3085_s0  }
  0x19   : > { %3035 = sst [smem:[#allocation10_spill]] %s2434_s30  ;;  %s2016_s25 = sadd.s32 4294967294, %s2458_s23  }
  0x1a   : > { %3036 = sst [smem:[#allocation11_spill]] %s2438_s20  ;;  %s45_s3 = sadd.s32 1, %s2450_s22 }
  0x1b   : > { %3037 = sst [smem:[#allocation12_spill]] %s2442_s21  ;;  %p46_p0 = scmp.ge.s32.totalorder %s45_s3, 2 }
  0x1c   : > { %3038 = sst [smem:[#allocation13_spill]] %s2446_s1  ;;  %s48_s26 = sadd.s32 1, %s2454_s2 }
  0x1d   : > { %3039 = sst [smem:[#allocation14_spill]] %s2450_s22  ;;  %p513_p1 = scmp.ne.s32.totalorder %s2438_s20, %s2434_s30 }
  0x1e   : > { %3040 = sst [smem:[#allocation15_spill]] %s2454_s2  ;;  %p514_p2 = scmp.eq.s32.totalorder %s2015_s24, 3 }
  0x1f   : > { %3041 = sst [smem:[#allocation16_spill]] %s2458_s23  ;;  %s3093_s3 = smov (%p46_p0, %s45_s3), 0 }
  0x20   : > { %3042 = sst [smem:[#allocation17_spill]] %s3093_s3  ;;  %s3095_s26 = smov (!%p46_p0, %s48_s26), %s2454_s2 }
  0x21   : > { %p2627_p3 = por %p514_p2, %p513_p1  ;;  %p519_p4 = scmp.ne.s32.totalorder %s2434_s30, %s2430_s0 }
  0x22   : > { %p50_p5 = scmp.ge.s32.totalorder %s3095_s26, 2  ;;  %p520_p6 = scmp.eq.s32.totalorder %s2016_s25, 3 }
  0x23   : > { %s3043_s27 = scalar_select %p2627_p3, 1, 0 }
  0x24   : > { %p2019_p7 = scmp.ge.s32.totalorder %s2458_s23, 1  ;;  %p669_p8 = scmp.lt.s32.totalorder %s2458_s23, 5 }
  0x25   : > { %3044 = sst [smem:[#allocation18_spill]] %s3043_s27  ;;  %s3097_s26 = smov (%p50_p5, %s3095_s26), 0 }
  0x26   : > { %3045 = sst [smem:[#allocation19_spill]] %s3097_s26  ;;  %p2637_p9 = por %p520_p6, %p519_p4 }
  0x27   : > { %p670_p10 = pnand %p2019_p7, %p669_p8  ;;  %s500_s29 = ssub.s32 %s2454_s2, %s3097_s26 }
  0x28   : > { %s3046_s28 = scalar_select %p2637_p9, 1, 0 }
  0x29   : > { %s503_s24 = sadd.s32 1, %s2438_s20  ;;  %p501_p11 = scmp.eq.s32.totalorder %s500_s29, 0 }
  0x2a   : > { %3047 = sst [smem:[#allocation20_spill]] %s3046_s28  ;;  %673 = sbr.rel (%p670_p10) target bundleno = 3230 (0xc9e), region = 92 }
  0x2b   : > { %s2645_s3 = scalar_select %p501_p11, %s2438_s20, %s503_s24  }
  0x2c   : > { %s2648_s25 = sand.u32 (!%p670_p10), 1, %s2434_s30   ;;  %p775_p12 = scmp.lt.s32.totalorder (!%p670_p10), %s2446_s1, 1 }
  0x2d   : > { %3048 = sst [smem:[#allocation21_spill]] %s2645_s3  ;;  %s2020_s22 = sshll.u32 (!%p670_p10), %s2648_s25, 3 }
  0x2e   : > { %p782_p13 = scmp.lt.s32.totalorder (!%p670_p10), %s2442_s21, 1  ;;  %s3050_s23 = sld [smem:[#allocation22_spill]] (!%p670_p10) }
  0x2f   : > { %s3051_s4 = sld [smem:[#allocation26_spill]] (!%p670_p10)  ;;  %s3052_s6 = sld [smem:[#allocation27_spill]] (!%p670_p10) }
  0x30   : > { %s3055_s10 = sld [smem:[#allocation30_spill]] (!%p670_p10)  ;;  %s3057_s20 = sld [smem:[#allocation32_spill]] (!%p670_p10) }
  0x31   : > { %s2654_s0 = scalar_select %p775_p12, %s2446_s1, 1 }
  0x32   : > { %s2657_s26 = scalar_select %p782_p13, %s2442_s21, 1 }
  0x33   : > { %s2021_s29 = sshll.u32 %s2654_s0, 3  ;;  %s2721_s12 = scalar_lea.vmem [#allocation3], %s2020_s22 }
  0x34   : > { %s778_s19 = scalar_lea.vmem %s3050_s23, %s2021_s29  ;;  %s2073_s18 = sshll.u32 %s2657_s26, 4 }
  0x35   : > { %s2671_s17 = scalar_lea.vmem %s3051_s4, %s2073_s18  ;;  %s2680_s2 = scalar_lea.vmem %s3052_s6, %s2073_s18 }
  0x36   : > { %s2697_s21 = scalar_lea.vmem %s3055_s10, %s2073_s18  ;;  %s2076_s6 = sshll.u32 %s2657_s26, 5 }
  0x37   : > { %s819_s30 = scalar_lea.vmem %s2994_s13, %s2657_s26  ;;  %s3056_s29 = sld [smem:[#allocation31_spill]] }
  0x38   : > { %s822_s4 = scalar_lea.vmem %s3057_s20, %s2657_s26  ;;  %s3058_s10 = sld [smem:[#allocation33_spill]] }
  0x39   : > { %s774_s14 = scalar_lea.vmem [#allocation5], %s2648_s25  ;;  %s3059_s15 = sld [smem:[#allocation12_spill]] }
  0x3d   : > { %s2711_s8 = scalar_lea.vmem %s3056_s29, %s2076_s6 }
  0x3e   : > { %s825_s9 = scalar_lea.vmem %s3058_s10, %s2657_s26 }
  0x3f   : > { %p2030_p0 = scmp.ne.s32.totalorder %s3059_s15, 0 }
  0x40   : > { %v831_v0 = vld [vmem:[%s778_s19] sm:$0xff] (!%p2030_p0)  ;;  %vm834_vm0 = vcmask (!%p2030_p0), 261120   ;;  %s3060_s15 = sld [smem:[#allocation24_spill]] (!%p2030_p0)  ;;  %s3061_s22 = sld [smem:[#allocation25_spill]] (!%p2030_p0) }
  0x41   : > { %830 = sbr.rel (%p2030_p0) target bundleno = 379 (0x17b), region = 96  ;;  %v835_v1 = vsel (!%p2030_p0), %vm834_vm0, %v831_v0, 0.0 }
  0x42   : > { %836 = vadd.xlane.f32.xlu0 (!%p2030_p0), %v835_v1 }
  0x46   : > { %v2031_v11 = vld [vmem:[%s3060_s15] ss:$0 sm:$0xff] (!%p2030_p0) }
  0x47   : > { %v2032_v13 = vld [vmem:[%s3061_s22] ss:$0 sm:$0xff] (!%p2030_p0) }
  0xcf   : > { %v837_v2 = vpop.xlane.xlu0 %836 }
  0xd0   : > { %v839_v3 = vmul.f32 0.03125, %v837_v2 }
  0xd2   : > { %v840_v4 = vsub.f32 %v831_v0, %v839_v3 }
  0xd4   : > { %v841_v5 = vmul.f32 %v840_v4, %v840_v4 }
  0xd6   : > { %v842_v6 = vsel %vm834_vm0, %v841_v5, 0.0 }
  0xd7   : > { %843 = vadd.xlane.f32.xlu0 %v842_v6 }
 0x164   : > { %v844_v7 = vpop.xlane.xlu0 %843 }
 0x165   : > { %v845_v8 = vmul.f32 0.03125, %v844_v7 }
 0x167   : > { %v846_v9 = vadd.f32 1e-12, %v845_v8 }
 0x169   : > { %2294 = vrsqrt.f32 %v846_v9 }
 0x173   : > { %v2295_v10 = vpop.eup %2294 }
 0x174   : > { %v848_v12 = vmul.f32 %v2295_v10, %v840_v4 }
 0x176   : > { %v855_v14 = vmul.f32 %v2031_v11, %v848_v12 }
 0x178   : > { %v862_v15 = vadd.f32 %v2032_v13, %v855_v14 }
 0x17a   : > { %863 = vst.msk [vmem:[#allocation2] sm:$0xff] %vm834_vm0, %v862_v15 }
 0x17b PF: > { %v2296_v16 = vld [vmem:[%s2671_s17] sm:$0xff]   ;;  %v2460_v17 = vmov 0.0   ;;  %v2297_v18 = vld [vmem:[%s2671_s17 + $0x8] sm:$0xff]   ;;  %vm2461_vm1 = vmmov 0   ;;  %vm889_vm2 = vcmask 261120   ;;  %s3062_s3 = scalar_lea.vmem %s2986_s5, %s2657_s26  ;;  %s2462_s24 = smov 120  }
 0x17c   : > { %2110 = vmatprep.subr.bf16.mxu0 %v2460_v17  ;;  %2118 = vmatprep.subr.bf16.mxu1 %v2460_v17  ;;  %v2033_v21 = vld [vmem:[%s3062_s3] ss:$0 sm:$0xff]  ;;  %s2463_s23 = smov 96   ;;  %s2464_s28 = smov 80   ;;  %vm944_vm3 = vcmask 64512   ;;  %vm1008_vm4 = vcmask 1043456  }
 0x17d   : > { %2111 = vmatpush3.bf16.msra.mxu0 %v2296_v16  ;;  %2114 = vmatprep.mubr.msk.bf16.mxu0 %vm2461_vm1, %v2460_v17  ;;  %s2465_s1 = smov 88   ;;  %s2466_s27 = smov 72   ;;  %vm1395_vm5 = vcmask 130048   ;;  %vm1397_vm6 = vcmask 195584   ;;  %vm1613_vm7 = vcmask 523264  }
 0x17e   : > { %2112 = vmatprep.subr.bf16.mxu0 %v2460_v17  ;;  %2120 = vmatprep.mubr.msk.bf16.mxu1 %vm2461_vm1, %v2460_v17  ;;  %s2467_s18 = smov 112   ;;  %s2468_s16 = smov 104  }
 0x17f   : > { %s3063_s15 = sld [smem:[#allocation23_spill]]  ;;  %s2470_s20 = smov 64  }
 0x180   : > { %s2471_s22 = smov 40   ;;  %s2472_s17 = smov 48  }
 0x181   : > { %v2740_v19 = vld [vmem:[#allocation2] sm:$0xff]  ;;  %2113 = vmatpush3.bf16.msra.mxu0 %v2297_v18  ;;  %s2473_s29 = smov 8   ;;  %s2474_s3 = smov 16  }
 0x182   : > { %v865_v20 = vpack.c.bf16 %v2740_v19, %v2740_v19  ;;  %2124 = vmatprep.subr.bf16.mxu0 %v2460_v17  ;;  %s3074_s10 = sld [smem:[#allocation35_spill]] }
 0x184   : > { %2115 = vmatmul.mubr.msk.bf16.vlgmr.msra.gmra.mrb[0].mxu0 %vm889_vm2, %v865_v20 }
 0x185   : > { %2126 = vmatprep.mubr.msk.bf16.mxu0 %vm2461_vm1, %v2460_v17  ;;  %s3064_s19 = scalar_lea.vmem %s3063_s15, %s2654_s0  ;;  %s2469_s0 = smov 56  }
 0x186   : > { %v2037_v39 = vld [vmem:[%s3064_s19] ss:$0 sm:$0xff] }
 0x257   : > { %v927_v22 = vpop.f32.mrb[0].mxu0 }
 0x258   : > { %v928_v23 = vadd.f32 %v2033_v21, %v927_v22  ;;  %v2116_v24 = vpop.f32.mrb[1].mxu0 }
 0x259   : > { %v930_v25 = vpop.f32.mrb[2].mxu0 }
 0x25a   : > { %v2756_v26 = vpack.c.bf16 %v928_v23, %v928_v23  ;;  %v2117_v27 = vpop.f32.mrb[3].mxu0 }
 0x25c   : > { %1052 = vrot.lane.b32.xlu1 %v2756_v26, %s2462_s24  ;;  %942 = vrot.lane.b32.xlu0 %v2756_v26, %s2463_s23  ;;  %s2475_s24 = smov 24  }
 0x260   : > { %1164 = vrot.lane.b32.xlu1 %v2756_v26, %s2464_s28  ;;  %1054 = vrot.lane.b32.xlu0 %v2756_v26, %s2465_s1  ;;  %s3065_s28 = scalar_lea.vmem %s2988_s7, %s2657_s26 }
 0x264   : > { %1274 = vrot.lane.b32.xlu1 %v2756_v26, %s2466_s27  ;;  %1162 = vrot.lane.b32.xlu0 %v2756_v26, %s2467_s18  ;;  %s3066_s18 = sld [smem:[#allocation28_spill]] }
 0x268   : > { %1272 = vrot.lane.b32.xlu0 %v2756_v26, %s2468_s16 }
 0x26a   : > { %s3067_s16 = scalar_lea.vmem %s3066_s18, %s2657_s26 }
 0x2ce   : > { %v943_v28 = vpop.permute.xlu0 %942  ;;  %v1053_v31 = vpop.permute.xlu1 %1052 }
 0x2cf   : > { %v949_v29 = vsel %vm944_vm3, %v943_v28, 0 }
 0x2d0   : > { %2119 = vmatpush3.bf16.xpose.msra.mxu1 %v949_v29 }
 0x2d1   : > { %2130 = vmatprep.subr.bf16.mxu1 %v2460_v17 }
 0x2d2   : > { %v1055_v30 = vpop.permute.xlu0 %1054  ;;  %v1165_v33 = vpop.permute.xlu1 %1164 }
 0x2d3   : > { %v1060_v32 = vsel %vm944_vm3, %v1055_v30, 0  ;;  %v1170_v34 = vsel %vm944_vm3, %v1165_v33, 0 }
 0x2d6   : > { %v1275_v35 = vpop.permute.xlu1 %1274  ;;  %v1163_v36 = vpop.permute.xlu0 %1162 }
 0x2d7   : > { %2121 = vmatmul.mubr.msk.bf16.vlgmr.msra.gmra.mrb[0].mxu1 %vm944_vm3, %v2756_v26  ;;  %v1280_v37 = vsel %vm944_vm3, %v1275_v35, 0 }
 0x2d8   : > { %2131 = vmatpush3.bf16.xpose.msra.mxu1 %v1060_v32  ;;  %2132 = vmatprep.mubr.msk.bf16.mxu1 %vm2461_vm1, %v2460_v17 }
 0x2d9   : > { %2142 = vmatprep.subr.bf16.mxu1 %v2460_v17 }
 0x2da   : > { %v1273_v38 = vpop.permute.xlu0 %1272 }
 0x2df   : > { %2133 = vmatmul.mubr.msk.bf16.vlgmr.msra.gmra.mrb[4].mxu1 %vm944_vm3, %v1053_v31 }
 0x2e0   : > { %2143 = vmatpush3.bf16.xpose.msra.mxu1 %v1170_v34  ;;  %2144 = vmatprep.mubr.msk.bf16.mxu1 %vm2461_vm1, %v2460_v17 }
 0x2e1   : > { %2154 = vmatprep.subr.bf16.mxu1 %v2460_v17 }
 0x2e7   : > { %2145 = vmatmul.mubr.msk.bf16.vlgmr.msra.gmra.mrb[8].mxu1 %vm944_vm3, %v1163_v36 }
 0x2e8   : > { %2155 = vmatpush3.bf16.xpose.msra.mxu1 %v1280_v37  ;;  %2156 = vmatprep.mubr.msk.bf16.mxu1 %vm2461_vm1, %v2460_v17 }
 0x2e9   : > { %2166 = vmatprep.subr.bf16.mxu1 %v2460_v17 }
 0x2ef   : > { %2157 = vmatmul.mubr.msk.bf16.vlgmr.msra.gmra.mrb[12].mxu1 %vm944_vm3, %v1273_v38 }
 0x2f0   : > { %2170 = vmatprep.mubr.msk.bf16.mxu1 %vm2461_vm1, %v2460_v17 }
 0x3aa   : > { %v985_v40 = vpop.f32.mrb[0].mxu1 }
 0x3ab   : > { %v986_v41 = vadd.f32 %v2037_v39, %v985_v40  ;;  %v2122_v42 = vpop.f32.mrb[1].mxu1 }
 0x3ac   : > { %v988_v43 = vpop.f32.mrb[2].mxu1 }
 0x3ad   : > { %v2123_v44 = vpop.f32.mrb[3].mxu1  ;;  %v991_v45 = vsel %vm944_vm3, %v986_v41, -inf }
 0x3ae   : > { %992 = vmax.xlane.f32.xlu1 %v991_v45 }
 0x3b2   : > { %v1096_v46 = vpop.f32.mrb[4].mxu1 }
 0x3b3   : > { %v1097_v47 = vadd.f32 %v2037_v39, %v1096_v46  ;;  %v2134_v48 = vpop.f32.mrb[5].mxu1 }
 0x3b4   : > { %v1099_v49 = vpop.f32.mrb[6].mxu1 }
 0x3b5   : > { %v2135_v50 = vpop.f32.mrb[7].mxu1  ;;  %v1102_v51 = vsel %vm944_vm3, %v1097_v47, -inf }
 0x3b6   : > { %1103 = vmax.xlane.f32.xlu0 %v1102_v51 }
 0x3ba   : > { %v1206_v52 = vpop.f32.mrb[8].mxu1 }
 0x3bb   : > { %v1207_v53 = vadd.f32 %v2037_v39, %v1206_v52  ;;  %v2146_v54 = vpop.f32.mrb[9].mxu1 }
 0x3bc   : > { %v1209_v55 = vpop.f32.mrb[10].mxu1  ;;  %v2298_v54 = vld [vmem:[%s2680_s2] sm:$0xff]  }
 0x3bd   : > { %v2147_v56 = vpop.f32.mrb[11].mxu1  ;;  %v1212_v57 = vsel %vm944_vm3, %v1207_v53, -inf  ;;  %2167 = vmatpush3.bf16.msra.mxu1 %v2298_v54  ;;  %v2299_v55 = vld [vmem:[%s2680_s2 + $0x8] sm:$0xff]  }
 0x3be   : > { %1213 = vmax.xlane.f32.xlu0 %v1212_v57  ;;  %2168 = vmatprep.subr.bf16.mxu1 %v2460_v17 }
 0x3c1   : > { %2169 = vmatpush3.bf16.msra.mxu1 %v2299_v55 }
 0x3c2   : > { %v1316_v58 = vpop.f32.mrb[12].mxu1  ;;  %2182 = vmatprep.subr.bf16.mxu1 %v2460_v17 }
 0x3c3   : > { %v1317_v59 = vadd.f32 %v2037_v39, %v1316_v58  ;;  %v2158_v60 = vpop.f32.mrb[13].mxu1 }
 0x3c4   : > { %v1319_v61 = vpop.f32.mrb[14].mxu1 }
 0x3c5   : > { %v2159_v62 = vpop.f32.mrb[15].mxu1  ;;  %v1322_v63 = vsel %vm944_vm3, %v1317_v59, -inf }
 0x3c6   : > { %1323 = vmax.xlane.f32.xlu1 %v1322_v63 }
 0x43b   : > { %v993_v0 = vpop.xlane.xlu1 %992 }
 0x43c   : > { %v994_v1 = vsub.f32 %v986_v41, %v993_v0 }
 0x43e   : > { %v995_v2 = vmul.f32 1.442695, %v994_v1 }
 0x440   : > { %2308 = vpow2.f32 %v995_v2 }
 0x443   : > { %v1104_v3 = vpop.xlane.xlu0 %1103 }
 0x444   : > { %v1105_v4 = vsub.f32 %v1097_v47, %v1104_v3 }
 0x446   : > { %v1106_v5 = vmul.f32 1.442695, %v1105_v4 }
 0x448   : > { %2310 = vpow2.f32 %v1106_v5 }
 0x44a   : > { %v2309_v6 = vpop.eup %2308 }
 0x44b   : > { %v1214_v7 = vpop.xlane.xlu0 %1213  ;;  %v997_v8 = vsel %vm944_vm3, %v2309_v6, 0.0 }
 0x44c   : > { %v1215_v9 = vsub.f32 %v1207_v53, %v1214_v7  ;;  %998 = vadd.xlane.f32.xlu0 %v997_v8  ;;  %v2046_v7 = vld [vmem:[%s3065_s28] ss:$0 sm:$0xff] }
 0x44e   : > { %v1216_v10 = vmul.f32 1.442695, %v1215_v9 }
 0x450   : > { %2312 = vpow2.f32 %v1216_v10 }
 0x452   : > { %v2311_v11 = vpop.eup %2310 }
 0x453   : > { %v1108_v12 = vsel %vm944_vm3, %v2311_v11, 0.0  ;;  %v1324_v15 = vpop.xlane.xlu1 %1323 }
 0x454   : > { %1109 = vadd.xlane.f32.xlu1 %v1108_v12  ;;  %v1325_v16 = vsub.f32 %v1317_v59, %v1324_v15 }
 0x456   : > { %v1326_v18 = vmul.f32 1.442695, %v1325_v16 }
 0x458   : > { %2314 = vpow2.f32 %v1326_v18 }
 0x45a   : > { %v2313_v13 = vpop.eup %2312 }
 0x45b   : > { %v1218_v14 = vsel %vm944_vm3, %v2313_v13, 0.0 }
 0x45c   : > { %1219 = vadd.xlane.f32.xlu0 %v1218_v14 }
 0x462   : > { %v2315_v20 = vpop.eup %2314 }
 0x463   : > { %v1328_v21 = vsel %vm944_vm3, %v2315_v20, 0.0 }
 0x465   : > { %1114 = vrot.lane.b32.xlu1 %v2756_v26, %s2469_s0 }
 0x472   : > { %1003 = vrot.lane.b32.xlu0 %v2756_v26, %s2470_s20  ;;  %s3070_s20 = scalar_lea.vmem %s2992_s11, %s2657_s26 }
 0x476   : > { %1334 = vrot.lane.b32.xlu0 %v2756_v26, %s2471_s22 }
 0x489   : > { %1329 = vadd.xlane.f32.xlu1 %v1328_v21 }
 0x49a   : > { %1224 = vrot.lane.b32.xlu1 %v2756_v26, %s2472_s17 }
 0x4d9   : > { %v999_v22 = vpop.xlane.xlu0 %998 }
 0x4da   : > { %2316 = vrcp.f32 %v999_v22  ;;  %v2300_v22 = vld [vmem:[%s2697_s21] sm:$0xff]  }
 0x4e1   : > { %v1110_v23 = vpop.xlane.xlu1 %1109 }
 0x4e2   : > { %2318 = vrcp.f32 %v1110_v23  ;;  %v2301_v23 = vld [vmem:[%s2697_s21 + $0x8] sm:$0xff]   ;;  %s3068_s21 = sld [smem:[#allocation29_spill]] }
 0x4e4   : > { %v2317_v24 = vpop.eup %2316 }
 0x4e5   : > { %v1001_v27 = vmul.f32 %v2317_v24, %v2309_v6  ;;  %v1115_v30 = vpop.permute.xlu1 %1114 }
 0x4e6   : > { %v1120_v33 = vsel %vm1008_vm4, %v1115_v30, 0 }
 0x4e7   : > { %v1002_v31 = vpack.c.bf16 %v1001_v27, %v1001_v27 }
 0x4e8   : > { %s3069_s15 = scalar_lea.vmem %s3068_s21, %s2657_s26  ;;  %s3075_s26 = sld [smem:[#allocation12_spill]] }
 0x4e9   : > { %v1220_v25 = vpop.xlane.xlu0 %1219  ;;  %v2051_v30 = vld [vmem:[%s3069_s15] ss:$0 sm:$0xff] }
 0x4ea   : > { %2320 = vrcp.f32 %v1220_v25 }
 0x4ec   : > { %v2319_v32 = vpop.eup %2318 }
 0x4ed   : > { %v1004_v28 = vpop.permute.xlu0 %1003  ;;  %v1112_v26 = vmul.f32 %v2319_v32, %v2311_v11 }
 0x4ee   : > { %v1010_v29 = vsel %vm1008_vm4, %v1004_v28, 0  ;;  %v2050_v28 = vld [vmem:[%s3067_s16] ss:$0 sm:$0xff]  ;;  %p2067_p1 = scmp.ne.s32.totalorder %s3075_s26, 1 }
 0x4ef   : > { %2125 = vmatpush3.bf16.msra.mxu0 %v1010_v29  ;;  %v1113_v34 = vpack.c.bf16 %v1112_v26, %v1112_v26  ;;  %v2302_v26 = vld [vmem:[%s2711_s8] sm:$0xff]   ;;  %vm1755_vm8 = vcmask (!%p2067_p1), 253952  }
 0x4f0   : > { %2136 = vmatprep.subr.bf16.mxu0 %v2460_v17 }
 0x4f1   : > { %v1335_v40 = vpop.permute.xlu0 %1334 }
 0x4f2   : > { %2127 = vmatmul.mubr.msk.bf16.vlgmr.msra.gmra.mrb[4].mxu0 %vm944_vm3, %v1002_v31  ;;  %v1340_v42 = vsel %vm1008_vm4, %v1335_v40, 0 }
 0x4f3   : > { %2137 = vmatpush3.bf16.msra.mxu0 %v1120_v33  ;;  %2138 = vmatprep.mubr.msk.bf16.mxu0 %vm2461_vm1, %v2460_v17 }
 0x4f4   : > { %2148 = vmatprep.subr.bf16.mxu0 %v2460_v17  ;;  %v2321_v35 = vpop.eup %2320 }
 0x4f5   : > { %v1222_v37 = vmul.f32 %v2321_v35, %v2313_v13  ;;  %v2304_v35 = vld [vmem:[%s2711_s8 + $0x10] sm:$0xff]  }
 0x4f7   : > { %v1223_v41 = vpack.c.bf16 %v1222_v37, %v1222_v37  ;;  %v2052_v37 = vld [vmem:[%s3070_s20] ss:$0 sm:$0xff] }
 0x4fa   : > { %2139 = vmatmul.mubr.msk.bf16.vlgmr.msra.gmra.mrb[8].mxu0 %vm944_vm3, %v1113_v34  ;;  %v2303_v34 = vld [vmem:[%s2711_s8 + $0x8] sm:$0xff]  }
 0x4fb   : > { %2150 = vmatprep.mubr.msk.bf16.mxu0 %vm2461_vm1, %v2460_v17 }
 0x516   : > { %v1330_v36 = vpop.xlane.xlu1 %1329 }
 0x517   : > { %2322 = vrcp.f32 %v1330_v36  ;;  %v2305_v36 = vld [vmem:[%s2711_s8 + $0x18] sm:$0xff]  }
 0x51a   : > { %v1225_v38 = vpop.permute.xlu1 %1224 }
 0x51b   : > { %v1230_v39 = vsel %vm1008_vm4, %v1225_v38, 0 }
 0x51c   : > { %2149 = vmatpush3.bf16.msra.mxu0 %v1230_v39 }
 0x51d   : > { %2160 = vmatprep.subr.bf16.mxu0 %v2460_v17 }
 0x51f   : > { %2151 = vmatmul.mubr.msk.bf16.vlgmr.msra.gmra.mrb[12].mxu0 %vm944_vm3, %v1223_v41 }
 0x520   : > { %2161 = vmatpush3.bf16.msra.mxu0 %v1340_v42  ;;  %2162 = vmatprep.mubr.msk.bf16.mxu0 %vm2461_vm1, %v2460_v17 }
 0x521   : > { %v2323_v43 = vpop.eup %2322  ;;  %2174 = vmatprep.subr.bf16.mxu0 %v2460_v17 }
 0x522   : > { %v1332_v44 = vmul.f32 %v2323_v43, %v2315_v20 }
 0x524   : > { %v1333_v45 = vpack.c.bf16 %v1332_v44, %v1332_v44 }
 0x527   : > { %2163 = vmatmul.mubr.msk.bf16.vlgmr.msra.gmra.mrb[16].mxu0 %vm944_vm3, %v1333_v45 }
 0x528   : > { %2178 = vmatprep.mubr.msk.bf16.mxu0 %vm2461_vm1, %v2460_v17  ;;  %2175 = vmatpush3.bf16.msra.mxu0 %v2300_v22 }
 0x529   : > { %2176 = vmatprep.subr.bf16.mxu0 %v2460_v17 }
 0x52c   : > { %2177 = vmatpush3.bf16.msra.mxu0 %v2301_v23 }
 0x52d   : > { %2194 = vmatprep.subr.bf16.mxu0 %v2460_v17 }
 0x5c5   : > { %v1046_v46 = vpop.f32.mrb[4].mxu0 }
 0x5c6   : > { %v2128_v47 = vpop.f32.mrb[5].mxu0 }
 0x5c7   : > { %v1049_v48 = vpop.f32.mrb[6].mxu0 }
 0x5c8   : > { %v2129_v49 = vpop.f32.mrb[7].mxu0 }
 0x5cd   : > { %v1156_v50 = vpop.f32.mrb[8].mxu0 }
 0x5ce   : > { %1383 = vrot.lane.b32.xlu1 %v1156_v50, %s2473_s29  ;;  %v2140_v51 = vpop.f32.mrb[9].mxu0  ;;  %s3071_s29 = sld [smem:[#allocation34_spill]] }
 0x5cf   : > { %v1159_v52 = vpop.f32.mrb[10].mxu0 }
 0x5d0   : > { %v2141_v53 = vpop.f32.mrb[11].mxu0 }
 0x5d1   : > { %v2056_v53 = vld [vmem:[%s819_s30] ss:$0 sm:$0xff] }
 0x5f2   : > { %v1266_v56 = vpop.f32.mrb[12].mxu0 }
 0x5f3   : > { %1387 = vrot.lane.b32.xlu0 %v1266_v56, %s2474_s3  ;;  %v2152_v57 = vpop.f32.mrb[13].mxu0 }
 0x5f4   : > { %v1269_v58 = vpop.f32.mrb[14].mxu0 }
 0x5f5   : > { %v2153_v59 = vpop.f32.mrb[15].mxu0 }
 0x5fa   : > { %v1376_v60 = vpop.f32.mrb[16].mxu0 }
 0x5fb   : > { %1391 = vrot.lane.b32.xlu1 %v1376_v60, %s2475_s24  ;;  %v2164_v61 = vpop.f32.mrb[17].mxu0 }
 0x5fc   : > { %v1379_v62 = vpop.f32.mrb[18].mxu0 }
 0x5fd   : > { %v2165_v63 = vpop.f32.mrb[19].mxu0 }
 0x640   : > { %v1384_v0 = vpop.permute.xlu1 %1383 }
 0x641   : > { %v1394_v2 = vsel %vm944_vm3, %v1046_v46, %v1384_v0 }
 0x665   : > { %v1388_v1 = vpop.permute.xlu0 %1387 }
 0x666   : > { %v1396_v3 = vsel %vm1395_vm5, %v1394_v2, %v1388_v1  ;;  %v2306_v2 = vld [vmem:[%s3071_s29] sm:$0xff]  }
 0x66d   : > { %v1392_v4 = vpop.permute.xlu1 %1391 }
 0x66e   : > { %v1398_v5 = vsel %vm1397_vm6, %v1396_v3, %v1392_v4  ;;  %v2307_v3 = vld [vmem:[%s3071_s29 + $0x8] sm:$0xff]  }
 0x66f   : > { %v1399_v6 = vpack.c.bf16 %v1398_v5, %v1398_v5 }
 0x671   : > { %2171 = vmatmul.mubr.msk.bf16.vlgmr.msra.gmra.mrb[16].mxu1 %vm889_vm2, %v1399_v6 }
 0x672   : > { %2190 = vmatprep.mubr.msk.bf16.mxu1 %vm2461_vm1, %v2460_v17  ;;  %2183 = vmatpush3.bf16.msra.mxu1 %v2302_v26 }
 0x673   : > { %2184 = vmatprep.subr.bf16.mxu1 %v2460_v17 }
 0x676   : > { %2185 = vmatpush3.bf16.msra.mxu1 %v2303_v34 }
 0x677   : > { %2186 = vmatprep.subr.bf16.mxu1 %v2460_v17 }
 0x67a   : > { %2187 = vmatpush3.bf16.msra.mxu1 %v2304_v35 }
 0x67b   : > { %2188 = vmatprep.subr.bf16.mxu1 %v2460_v17 }
 0x67e   : > { %2189 = vmatpush3.bf16.msra.mxu1 %v2305_v36 }
 0x744   : > { %v1460_v8 = vpop.f32.mrb[16].mxu1 }
 0x745   : > { %v1461_v9 = vadd.f32 %v2046_v7, %v1460_v8  ;;  %v2172_v10 = vpop.f32.mrb[17].mxu1  ;;  %v2062_v8 = vld [vmem:[%s822_s4] ss:$0 sm:$0xff] }
 0x746   : > { %v1463_v11 = vpop.f32.mrb[18].mxu1 }
 0x747   : > { %v2173_v12 = vpop.f32.mrb[19].mxu1  ;;  %v1466_v13 = vadd.f32 %v1461_v9, %v2740_v19 }
 0x749   : > { %v1469_v14 = vsel %vm889_vm2, %v1466_v13, 0.0 }
 0x74a   : > { %1470 = vadd.xlane.f32.xlu0 %v1469_v14 }
 0x7d7   : > { %v1471_v15 = vpop.xlane.xlu0 %1470 }
 0x7d8   : > { %v1473_v16 = vmul.f32 0.03125, %v1471_v15 }
 0x7da   : > { %v1474_v18 = vsub.f32 %v1466_v13, %v1473_v16  ;;  %v1693_v13 = vld [vmem:[%s3074_s10] sm:$0x1] }
 0x7dc   : > { %v1475_v20 = vmul.f32 %v1474_v18, %v1474_v18 }
 0x7de   : > { %v1476_v21 = vsel %vm889_vm2, %v1475_v20, 0.0 }
 0x7df   : > { %1477 = vadd.xlane.f32.xlu1 %v1476_v21 }
 0x86c   : > { %v1478_v19 = vpop.xlane.xlu1 %1477 }
 0x86d   : > { %v1479_v24 = vmul.f32 0.03125, %v1478_v19 }
 0x86f   : > { %v1480_v25 = vadd.f32 1e-12, %v1479_v24 }
 0x871   : > { %2324 = vrsqrt.f32 %v1480_v25 }
 0x87b   : > { %v2325_v27 = vpop.eup %2324 }
 0x87c   : > { %v1482_v29 = vmul.f32 %v2325_v27, %v1474_v18 }
 0x87e   : > { %v1489_v31 = vmul.f32 %v2050_v28, %v1482_v29 }
 0x880   : > { %v1496_v32 = vadd.f32 %v2051_v30, %v1489_v31 }
 0x882   : > { %v1497_v33 = vpack.c.bf16 %v1496_v32, %v1496_v32 }
 0x884   : > { %2179 = vmatmul.mubr.msk.bf16.vlgmr.msra.gmra.mrb[20].mxu0 %vm889_vm2, %v1497_v33 }
 0x885   : > { %2198 = vmatprep.mubr.msk.bf16.mxu0 %vm2461_vm1, %v2460_v17  ;;  %2195 = vmatpush3.bf16.msra.mxu0 %v2306_v2 }
 0x886   : > { %2196 = vmatprep.subr.bf16.mxu0 %v2460_v17  ;;  %v2063_v17 = vld [vmem:[%s825_s9] ss:$0 sm:$0xff] }
 0x889   : > { %2197 = vmatpush3.bf16.msra.mxu0 %v2307_v3 }
 0x957   : > { %v1558_v38 = vpop.f32.mrb[20].mxu0 }
 0x958   : > { %v1559_v39 = vadd.f32 %v2052_v37, %v1558_v38  ;;  %v2180_v40 = vpop.f32.mrb[21].mxu0 }
 0x959   : > { %v1561_v41 = vpop.f32.mrb[22].mxu0 }
 0x95a   : > { %v1564_v42 = vmul.f32 %v1559_v39, %v1559_v39  ;;  %v2181_v43 = vpop.f32.mrb[23].mxu0 }
 0x95c   : > { %v1565_v44 = vmul.f32 %v1564_v42, %v1559_v39 }
 0x95e   : > { %v1566_v45 = vmul.f32 0.044715, %v1565_v44 }
 0x960   : > { %v1567_v46 = vadd.f32 %v1566_v45, %v1559_v39 }
 0x962   : > { %v1568_v47 = vmul.f32 0.7978846, %v1567_v46 }
 0x964   : > { %2326 = vtanh.f32 %v1568_v47 }
 0x96e   : > { %v2327_v48 = vpop.eup %2326 }
 0x96f   : > { %v1570_v49 = vadd.f32 1.0, %v2327_v48 }
 0x971   : > { %v1571_v50 = vmul.f32 0.5, %v1570_v49 }
 0x973   : > { %v1572_v51 = vmul.f32 %v1571_v50, %v1559_v39 }
 0x975   : > { %v1573_v52 = vpack.c.bf16 %v1572_v51, %v1572_v51 }
 0x977   : > { %2191 = vmatmul.mubr.msk.bf16.vlgmr.msra.gmra.mrb[20].mxu1 %vm1613_vm7, %v1573_v52 }
 0xa4a   : > { %v1651_v54 = vpop.f32.mrb[20].mxu1 }
 0xa4b   : > { %v1652_v55 = vadd.f32 %v2056_v53, %v1651_v54  ;;  %v2192_v56 = vpop.f32.mrb[21].mxu1 }
 0xa4c   : > { %v1654_v57 = vpop.f32.mrb[22].mxu1 }
 0xa4d   : > { %v2193_v58 = vpop.f32.mrb[23].mxu1  ;;  %v1657_v59 = vadd.f32 %v1652_v55, %v1496_v32 }
 0xa4f   : > { %v1660_v60 = vsel %vm889_vm2, %v1657_v59, 0.0 }
 0xa50   : > { %1661 = vadd.xlane.f32.xlu0 %v1660_v60 }
 0xadd   : > { %v1662_v61 = vpop.xlane.xlu0 %1661 }
 0xade   : > { %v1663_v62 = vmul.f32 0.03125, %v1662_v61 }
 0xae0   : > { %v1664_v63 = vsub.f32 %v1657_v59, %v1663_v62 }
 0xae2   : > { %v1665_v0 = vmul.f32 %v1664_v63, %v1664_v63 }
 0xae4   : > { %v1666_v1 = vsel %vm889_vm2, %v1665_v0, 0.0 }
 0xae5   : > { %1667 = vadd.xlane.f32.xlu0 %v1666_v1 }
 0xb72   : > { %v1668_v4 = vpop.xlane.xlu0 %1667 }
 0xb73   : > { %v1669_v5 = vmul.f32 0.03125, %v1668_v4 }
 0xb75   : > { %v1670_v6 = vadd.f32 1e-12, %v1669_v5 }
 0xb77   : > { %2328 = vrsqrt.f32 %v1670_v6 }
 0xb81   : > { %v2329_v7 = vpop.eup %2328 }
 0xb82   : > { %v1672_v9 = vmul.f32 %v2329_v7, %v1664_v63 }
 0xb84   : > { %v1679_v10 = vmul.f32 %v2062_v8, %v1672_v9 }
 0xb86   : > { %v1686_v11 = vadd.f32 %v2063_v17, %v1679_v10 }
 0xb88   : > { %1687 = vst.msk [vmem:[#allocation2] sm:$0xff] %vm889_vm2, %v1686_v11  ;;  %v1688_v12 = vpack.c.bf16 %v1686_v11, %v1686_v11  ;;  %1754 = vst.msk [vmem:[%s2721_s12] sm:$0xff] (!%p2067_p1), %vm889_vm2, %v1686_v11 }
 0xb8a   : > { %2199 = vmatmul.mubr.msk.bf16.vlgmr.msra.gmra.mrb[24].mxu0 %vm889_vm2, %v1688_v12 }
 0xc5d   : > { %v1743_v14 = vpop.f32.mrb[24].mxu0 }
 0xc5e   : > { %v1744_v15 = vadd.f32 %v1743_v14, %v1693_v13  ;;  %v2200_v16 = vpop.f32.mrb[25].mxu0 }
 0xc5f   : > { %v1746_v18 = vpop.f32.mrb[26].mxu0 }
 0xc60   : > { %2330 = vtanh.f32 %v1744_v15  ;;  %v2201_v20 = vpop.f32.mrb[27].mxu0 }
 0xc64   : > { %1753 = sbr.rel (%p2067_p1) target bundleno = 3180 (0xc6c), region = 100 }
 0xc6a   : > { %v2331_v21 = vpop.eup %2330 }
 0xc6b   : > { %1756 = vst.msk [vmem:[%s774_s14] sm:$0x1] %vm1755_vm8, %v2331_v21 }
 0xc6c PF: > { %s3076_s9 = sld [smem:[#allocation13_spill]]  ;;  %s3078_s0 = sld [smem:[#allocation36_spill]] }
 0xc6d   : > { %s1775_s22 = sshll.u32 %s2721_s12, 4  ;;  %s1758_s17 = scalar_lea.sflag [#allocation4], %s2648_s25  ;;  %s1776_s22 = int_to_ptr.vmem [resolvable:$true] %s1775_s22 }
 0xc6e   : > { %s2332_s30 = scalar_lea.vmem %s1776_s22, 128  ;;  %s2476_s3 = smov [#allocation3]  }
 0xc6f   : > { %p2333_p2 = scmp.ne.s32.totalorder %s1776_s22, %s2332_s30  ;;  %s2336_s24 = sshll.u32 %s2476_s3, 4  ;;  %s2337_s24 = int_to_ptr.vmem [resolvable:$false] %s2336_s24 }
 0xc70   : > { %s2338_s2 = scalar_lea.vmem %s2337_s24, 256  ;;  %p2339_p6 = scmp.lt.s32.totalorder %s1776_s22, %s2337_s24 }
 0xc71   : > { %p2334_p4 = pnand %p2333_p2, %p2627_p3  ;;  %p2340_p7 = scmp.lt.s32.totalorder %s2338_s2, %s2332_s30 }
 0xc72   : > { %s2069_s21 = sshll.u32 %s3076_s9, 7  ;;  %s3079_s8 = smov %s3078_s0 }
 0xc73   : > { %s2906_s20 = scalar_lea.hbm %s3078_s0, %s2069_s21  ;;  %p2335_p5 = pneg %p2334_p4 }
 0xc74   : > { %p2341_p8 = por %p2340_p7, %p2339_p6 }
 0xc76   : > { %p2342_p10 = pnand %p2341_p8, %p2335_p5 }
 0xc78   : > { %2345 = shalt.err (!%p2342_p10)
}
 0xc79   : > { %s2346_s12 = scalar_lea.hbm %s2906_s20, 128  ;;  %s2350_s1 = scalar_lea.hbm %s3079_s8, 256 }
 0xc7a   : > { %p2347_p11 = scmp.ne.s32.totalorder %s2906_s20, %s2346_s12  ;;  %p2351_p0 = scmp.lt.u32.totalorder %s2906_s20, %s3079_s8 }
 0xc7b   : > { %p2352_p1 = scmp.lt.u32.totalorder %s2350_s1, %s2346_s12  ;;  %p2354_p4 = scmp.lt.u32.totalorder %s2346_s12, %s2906_s20 }
 0xc7c   : > { %p2348_p12 = pnand %p2347_p11, %p2627_p3 }
 0xc7d   : > { %p2353_p2 = por %p2352_p1, %p2351_p0 }
 0xc7e   : > { %p2349_p13 = pneg %p2348_p12 }
 0xc7f   : > { %p2355_p5 = por %p2354_p4, %p2353_p2 }
 0xc81   : > { %p2356_p6 = pnand %p2355_p5, %p2349_p13 }
 0xc83   : > { %2359 = shalt.err (!%p2356_p6)
}
 0xc84   : > { %2202 = dma.vmem_to_hbm [thread:$0]  (%p2627_p3), %s1776_s22, 128, %s2906_s20, %s1758_s17  }
 0xc85   : > { %s2070_s16 = sshll.u32 %s3076_s9, 4  ;;  %s1788_s6 = sshll.u32 %s774_s14, 4  ;;  %s1789_s6 = int_to_ptr.vmem [resolvable:$true] %s1788_s6 }
 0xc86   : > { %s3080_s21 = sld [smem:[#allocation37_spill]]  ;;  %s1763_s0 = scalar_lea.sflag [#allocation6], %s2648_s25 }
 0xc87   : > { %s2360_s30 = scalar_lea.vmem %s1789_s6, 16  ;;  %s2477_s3 = smov [#allocation5]  }
 0xc88   : > { %p2361_p7 = scmp.ne.s32.totalorder %s1789_s6, %s2360_s30  ;;  %s2364_s24 = sshll.u32 %s2477_s3, 4  ;;  %s2365_s24 = int_to_ptr.vmem [resolvable:$false] %s2364_s24 }
 0xc89   : > { %s2366_s2 = scalar_lea.vmem %s2365_s24, 32  ;;  %p2367_p11 = scmp.lt.s32.totalorder %s1789_s6, %s2365_s24 }
 0xc8a   : > { %p2362_p8 = pnand %p2361_p7, %p2627_p3  ;;  %p2368_p12 = scmp.lt.s32.totalorder %s2366_s2, %s2360_s30 }
 0xc8c   : > { %s3081_s15 = smov %s3080_s21  ;;  %s2933_s19 = scalar_lea.hbm %s3080_s21, %s2070_s16 }
 0xc8d   : > { %p2363_p10 = pneg %p2362_p8  ;;  %p2369_p13 = por %p2368_p12, %p2367_p11 }
 0xc8f   : > { %p2370_p0 = pnand %p2369_p13, %p2363_p10 }
 0xc91   : > { %2373 = shalt.err (!%p2370_p0)
}
 0xc92   : > { %s2374_s25 = scalar_lea.hbm %s2933_s19, 16  ;;  %s2378_s20 = scalar_lea.hbm %s3081_s15, 32 }
 0xc93   : > { %p2375_p1 = scmp.ne.s32.totalorder %s2933_s19, %s2374_s25  ;;  %p2379_p5 = scmp.lt.u32.totalorder %s2933_s19, %s3081_s15 }
 0xc94   : > { %p2380_p6 = scmp.lt.u32.totalorder %s2378_s20, %s2374_s25  ;;  %p2382_p8 = scmp.lt.u32.totalorder %s2374_s25, %s2933_s19 }
 0xc95   : > { %p2376_p2 = pnand %p2375_p1, %p2627_p3 }
 0xc96   : > { %p2381_p7 = por %p2380_p6, %p2379_p5 }
 0xc97   : > { %p2377_p4 = pneg %p2376_p2 }
 0xc98   : > { %p2383_p10 = por %p2382_p8, %p2381_p7 }
 0xc9a   : > { %p2384_p11 = pnand %p2383_p10, %p2377_p4 }
 0xc9c   : > { %2387 = shalt.err (!%p2384_p11)
}
 0xc9d   : > { %2203 = dma.vmem_to_hbm [thread:$0]  (%p2627_p3), %s1789_s6, 16, %s2933_s19, %s1763_s0  }
 0xc9e PF: > { %s3082_s12 = sld [smem:[#allocation16_spill]]  ;;  %s3083_s23 = sld [smem:[#allocation9_spill]] }
 0xca4   : > { %p2213_p12 = scmp.ge.s32.totalorder %s3082_s12, 2  ;;  %s1800_s1 = sand.u32 1, %s3083_s23  }
 0xca5   : > { %s1801_s27 = scalar_lea.sflag [#allocation4], %s1800_s1 }
 0xca6   : > { %p2207_p13 = pnand %p2213_p12, %p2637_p9 }
 0xca8   : > { %2421 = dma.done.wait (!%p2207_p13), %s1801_s27, 128  }
 0xca9   : > { %2423 = vsyncadd (!%p2207_p13), %s1801_s27, 4294967168  ;;  %s1810_s18 = scalar_lea.sflag [#allocation6], %s1800_s1 }
 0xcaa   : > { %2425 = dma.done.wait (!%p2207_p13), %s1810_s18, 16  }
 0xcab   : > { %2427 = vsyncadd (!%p2207_p13), %s1810_s18, 4294967280  ;;  %s36_s23 = sadd.s32 1, %s3082_s12   ;;  %s3085_s0 = sld [smem:[#allocation10_spill]] }
 0xcac   : > { %p33_p0 = scmp.ge.s32.totalorder %s36_s23, 6   ;;  %s3086_s30 = sld [smem:[#allocation11_spill]] }
 0xcad   : > { %s3087_s20 = sld [smem:[#allocation21_spill]]  ;;  %s3088_s21 = sld [smem:[#allocation14_spill]] }
 0xcae   : > { %s3089_s1 = sld [smem:[#allocation15_spill]]  ;;  %s3090_s22 = sld [smem:[#allocation17_spill]] }
 0xcaf   : > { %s3091_s2 = sld [smem:[#allocation19_spill]]  ;;  %35 = sbr.rel (!%p33_p0) target bundleno = 24 (0x18), region = 191 }
 0xcb6   :  { %1814 = vsyncpa [#allocation4], 1 }
 0xcb7   :  { %1816 = vsyncpa [#allocation4 + $0x1], 1 }
 0xcb8   :  { %1817 = vsyncpa [#allocation6], 1 }
 0xcb9   :  { %1819 = vsyncpa [#allocation6 + $0x1], 1 }

</bundles_post_ra>
